<compile_context>
chip_gen: v7x
topology: tpu7x:2x2x1
jax: 0.10.0
libtpu: 0.0.40
codegen_flags: <defaults>
</compile_context>

<pallas_src>
import functools
import math

import numpy as np
import jax
import jax.numpy as jnp
from jax.experimental import pallas as pl
from jax.experimental.pallas import tpu as pltpu


MARGIN = 128                      # lane-aligned halo margin (>= W + 1)


def _round_up8(c):
    return max(8, ((c + 7) // 8) * 8)


# -----------------------------------------------------------------------------
# Fused forward kernel (B packed images per grid step)
# -----------------------------------------------------------------------------
def _make_scnn_kernel(kinds, H, W, feature_size, cin_pad, images_per_step):
    """In-kernel activation layout: (C, B*H*W) -- channels in sublanes,
    packed flattened spatial positions (b*HW + h*W + w) in lanes."""
    B = images_per_step
    HW = H * W
    BHW = B * HW
    lo, hi = MARGIN, MARGIN + BHW
    Cf = feature_size
    mrows = max(cin_pad, Cf)                       # max rows per im2col block
    n_layers = len(kinds)
    taps = [(t // 3 - 1, t % 3 - 1) for t in range(9)]          # (dy, dx)
    phases = ((0, 0), (0, 1), (1, 0), (1, 1))

    def kernel(*refs):
        x_ref = refs[0]                            # (1, cin_pad, BHW) f32
        mask_ref = refs[1]                         # (9, BHW) f32
        w_refs = refs[2:2 + 2 * n_layers]          # (W bf16, b f32) per layer
        out_ref = refs[2 + 2 * n_layers]           # (1, 1, 4*BHW) f32
        pad_ref, patch_ref = refs[3 + 2 * n_layers:]

        # Zero the halo margins once per grid step.  Every read from them is
        # multiplied by a zero mask, but stale VMEM could hold NaNs.
        zeros_m = jnp.zeros((pad_ref.shape[0], MARGIN), jnp.float32)
        pad_ref[:, 0:MARGIN] = zeros_m
        pad_ref[:, hi:hi + MARGIN] = zeros_m

        # Hoisted per-tap validity masks, pre-broadcast once to a full im2col
        # block height and reused across all layers / taps / phases.
        masks_b = [jnp.broadcast_to(mask_ref[t:t + 1, :], (mrows, BHW))
                   for t in range(9)]

        def write_tap(tap, src_row, rows, off, m_idx, col0):
            win = pad_ref[src_row:src_row + rows, lo + off:lo + off + BHW]
            if m_idx != 4:                         # the (0,0) tap is all-valid
                mk = masks_b[m_idx] if rows == mrows else masks_b[m_idx][0:rows]
                win = win * mk                     # f32 elementwise
            patch_ref[tap * rows:(tap + 1) * rows, col0:col0 + BHW] = (
                win.astype(patch_ref.dtype))       # bf16 only at MXU input

        act = x_ref[0]                             # (cin_pad, BHW) f32

        for li, kind in enumerate(kinds):
            w_mat = w_refs[2 * li][...]            # (Cout, 9*Cin) bf16
            b_col = w_refs[2 * li + 1][...]        # (Cout, 1) f32

            if kind != "final":
                # Plain 3x3 same-conv as ONE matmul over im2col patches.
                rows = act.shape[0]
                pad_ref[0:rows, lo:hi] = act
                for t, (dy, dx) in enumerate(taps):
                    write_tap(t, 0, rows, dy * W + dx,
                              (dy + 1) * 3 + (dx + 1), 0)
                patches = patch_ref[0:9 * rows, 0:BHW]
                out = jnp.dot(w_mat, patches,
                              preferred_element_type=jnp.float32) + b_col
                # convRelu and UpSampleBlock both end in LeakyReLU(0.01); for
                # the upsample conv applying it before the shuffle is
                # equivalent (the shuffle is a permutation).
                act = jnp.where(out > 0, out, 0.01 * out)
            else:
                # Final 3x3 conv fused with the preceding PixelShuffle: all 4
                # output phases assembled side-by-side in lanes -> ONE matmul
                # and one lane-dense (1, 4*BHW) store.
                pad_ref[0:4 * Cf, lo:hi] = act     # all four phases at once
                for p, (pa, pb) in enumerate(phases):
                    for t, (dy, dx) in enumerate(taps):
                        i_src, s_y = (pa + dy) % 2, (pa + dy) // 2
                        j_src, s_x = (pb + dx) % 2, (pb + dx) // 2
                        write_tap(t, (i_src * 2 + j_src) * Cf, Cf,
                                  s_y * W + s_x, (s_y + 1) * 3 + (s_x + 1),
                                  p * BHW)
                patches = patch_ref[0:9 * Cf, 0:4 * BHW]
                z = jnp.dot(w_mat, patches,
                            preferred_element_type=jnp.float32) + b_col
                out_ref[0, 0:1, :] = z             # (1, 4*BHW) unmasked store

    return kernel


def _choose_images_per_step(n):
    """Largest packing B dividing N that still leaves >= 2 grid steps
    (v7x has 2 TensorCores), capped for VMEM headroom."""
    best = 1
    for b in range(1, min(n, 32) + 1):
        if n % b == 0 and (n // b >= 2 or n < 2):
            best = b
    return best


def scnn_forward_pallas(x_nchw, flat_params, *, kinds, feature_size,
                        images_per_step=None):
    """Fused sCNN forward.  x_nchw: (N, Cin, H, W) f32 -> (N, 1, 2H, 2W)."""
    N, Cin, H, W = x_nchw.shape
    HW = H * W
    cin_pad = _round_up8(Cin)
    if images_per_step is None:
        images_per_step = _choose_images_per_step(N)
    B = images_per_step
    assert N % B == 0
    G = N // B
    BHW = B * HW
    mrows = max(cin_pad, feature_size)

    # Pad input channels to a sublane-aligned count and pack B images
    # side-by-side along the lane dimension: (G, cin_pad, B*HW).
    x = x_nchw.astype(jnp.float32)
    if Cin < cin_pad:
        x = jnp.pad(x, ((0, 0), (0, cin_pad - Cin), (0, 0), (0, 0)))
    x_packed = (x.reshape(G, B, cin_pad, HW)
                 .transpose(0, 2, 1, 3)
                 .reshape(G, cin_pad, BHW))

    # Full per-tap validity masks:
    # mask[(dy+1)*3+(dx+1), b*HW + h*W + w] = 1 iff 0<=h+dy<H and 0<=w+dx<W.
    # (These also zero any cross-image bleed in the packed lane layout.)
    row = np.arange(HW, dtype=np.int64) // W
    col = np.arange(HW, dtype=np.int64) % W
    masks = np.zeros((9, HW), np.float32)
    for t in range(9):
        dy, dx = t // 3 - 1, t % 3 - 1
        masks[t] = ((row + dy >= 0) & (row + dy < H)
                    & (col + dx >= 0) & (col + dx < W)).astype(np.float32)
    masks = jnp.asarray(np.tile(masks, (1, B)))                  # (9, B*HW)

    kernel = _make_scnn_kernel(kinds, H, W, feature_size, cin_pad, B)

    in_specs = [
        pl.BlockSpec((1, cin_pad, BHW), lambda n: (n, 0, 0)),
        pl.BlockSpec((9, BHW), lambda n: (0, 0)),
    ]
    for _arr in flat_params:                  # all weight/bias arrays are 2-D
        in_specs.append(pl.BlockSpec(_arr.shape, lambda n: (0, 0)))

    out = pl.pallas_call(
        kernel,
        out_shape=jax.ShapeDtypeStruct((G, 1, 4 * BHW), jnp.float32),
        grid=(G,),
        in_specs=in_specs,
        out_specs=pl.BlockSpec((1, 1, 4 * BHW), lambda n: (n, 0, 0)),
        scratch_shapes=[
            pltpu.VMEM((max(cin_pad, 4 * feature_size),
                        MARGIN + BHW + MARGIN), jnp.float32),  # haloed act
            pltpu.VMEM((9 * mrows, 4 * BHW), jnp.bfloat16),    # im2col patches
        ],
        compiler_params=pltpu.CompilerParams(
            dimension_semantics=("parallel",)),   # batch across v7x's 2 TCs
    )(x_packed, masks, *flat_params)

    # Un-pack: output columns are ordered (phase a*2+c, image, h, w).
    # TODO(synk): this tiny phase->spatial interleave could be folded into the
    # kernel with strided stores; kept as one small wrapper op.
    o = out.reshape(G, 2, 2, B, H, W)
    o = jnp.transpose(o, (0, 3, 4, 1, 5, 2))          # (G, B, H, 2, W, 2)
    return o.reshape(N, 1, 2 * H, 2 * W)


# -----------------------------------------------------------------------------
# Parameter construction (deterministic) and kernel-layout packing
# -----------------------------------------------------------------------------
def make_conv_params(key, cin, cout):
    kw, kb = jax.random.split(key)
    w = 0.1 * jax.random.normal(kw, (3, 3, cin, cout), dtype=jnp.float32)  # HWIO
    b = 0.1 * jax.random.normal(kb, (cout,), dtype=jnp.float32)
    return w, b


def init_scnn_params(key, inp_channel, feature_size, depth, scale):
    n_up = int(math.log2(scale))
    keys = jax.random.split(key, 1 + depth + n_up + 1)
    params, ki = [], 0
    params.append(("conv_lrelu",
                   make_conv_params(keys[ki], inp_channel, feature_size))); ki += 1
    for _ in range(depth):
        params.append(("conv_lrelu",
                       make_conv_params(keys[ki], feature_size, feature_size))); ki += 1
    for _ in range(n_up):
        params.append(("upsample",
                       make_conv_params(keys[ki], feature_size, feature_size * 4))); ki += 1
    params.append(("final", make_conv_params(keys[ki], feature_size, 1))); ki += 1
    return params


def prepare_kernel_params(params, cin_pad):
    """HWIO conv weights -> (Cout, 9*Cin) bf16 matmul weights + f32 biases.

    * Layer 0's input channels are zero-padded to `cin_pad` (matching the
      zero-padded activation rows) so im2col blocks are sublane-aligned.
    * The upsample conv's output rows are permuted from PixelShuffle order
      (c*4 + i*2 + j) to grouped order ((i*2 + j)*C + c) so each polyphase of
      the 2x image is a contiguous row block inside the kernel.
    """
    flat = []
    for idx, (kind, (w, b)) in enumerate(params):
        w = np.asarray(w, np.float32)
        b = np.asarray(b, np.float32)
        kh, kw, cin, cout = w.shape
        if idx == 0 and cin < cin_pad:
            w = np.pad(w, ((0, 0), (0, 0), (0, cin_pad - cin), (0, 0)))
            cin = cin_pad
        w_mat = w.reshape(kh * kw * cin, cout).T          # (Cout, 9*Cin)
        b_col = b.reshape(cout, 1)
        if kind == "upsample":
            r = 2
            C = cout // (r * r)
            perm = np.array([(g % C) * (r * r) + g // C for g in range(cout)])
            w_mat = w_mat[perm]
            b_col = b_col[perm]
        flat.append(jnp.asarray(w_mat, dtype=jnp.bfloat16))
        flat.append(jnp.asarray(b_col, dtype=jnp.float32))
    return flat


# -----------------------------------------------------------------------------
# Plain-JAX reference (mirrors the PyTorch module) -- used only for checking
# -----------------------------------------------------------------------------
def _leaky(x):
    return jnp.where(x > 0, x, 0.01 * x)


def _conv3x3_ref(x, w_hwio, b):
    y = jax.lax.conv_general_dilated(
        x, w_hwio, window_strides=(1, 1), padding=((1, 1), (1, 1)),
        dimension_numbers=("NCHW", "HWIO", "NCHW"),
        precision=jax.lax.Precision.HIGHEST)
    return y + b.reshape(1, -1, 1, 1)


def _pixel_shuffle_ref(x, r):
    N, Crr, H, W = x.shape
    C = Crr // (r * r)
    x = x.reshape(N, C, r, r, H, W)
    x = jnp.transpose(x, (0, 1, 4, 2, 5, 3))
    return x.reshape(N, C, H * r, W * r)


def scnn_reference(params, x):
    act = x.astype(jnp.float32)
    for kind, (w, b) in params:
        y = _conv3x3_ref(act, w, b)
        if kind == "conv_lrelu":
            act = _leaky(y)
        elif kind == "upsample":
            act = _leaky(_pixel_shuffle_ref(y, 2))
        else:
            act = y
    return act


# -----------------------------------------------------------------------------
# Main
# -----------------------------------------------------------------------------
if __name__ == "__main__":
    key = jax.random.PRNGKey(0)
    k_params, k_x = jax.random.split(key)

    # sCNN_Complete(inpChannel=1, featureSize=8, depth=2, scale=2)
    inp_channel, feature_size, depth, scale = 1, 8, 2, 2
    params = init_scnn_params(k_params, inp_channel, feature_size, depth, scale)
    kinds = [k for k, _ in params]

    # The fused kernel folds exactly one PixelShuffle into the final conv.
    # TODO(synk): scale > 2 (multiple UpSampleBlocks) would need in-kernel
    # shuffles at growing resolutions; not implemented here.
    assert kinds[-2:] == ["upsample", "final"]
    assert all(k == "conv_lrelu" for k in kinds[:-2])

    # Input in PyTorch NCHW convention: (batch=2, channels=1, 16, 16)
    x = jax.random.normal(k_x, (2, inp_channel, 16, 16), dtype=jnp.float32)

    flat_params = prepare_kernel_params(params, cin_pad=_round_up8(inp_channel))
    fwd = jax.jit(functools.partial(
        scnn_forward_pallas, kinds=tuple(kinds), feature_size=feature_size))

    out = jax.block_until_ready(fwd(x, flat_params))

    expected_shape = (2, 1, 16 * scale, 16 * scale)
    assert out.shape == expected_shape, (out.shape, expected_shape)
    assert bool(jnp.all(jnp.isfinite(out)))

    # Verify against the plain-JAX/XLA reference of the PyTorch module.
    ref = scnn_reference(params, x)
    max_err = float(jnp.max(jnp.abs(out - ref)))
    assert max_err < 2e-2, f"mismatch vs reference: max abs err = {max_err}"

    print("KERNEL_OK")
</pallas_src>

<mosaic_0001>
module attributes {stable_mosaic.version = 11 : i64} {
  func.func @kernel(%arg0: i32, %arg1: memref<1x8x256xf32, #tpu.memory_space<vmem>>, %arg2: memref<9x256xf32, #tpu.memory_space<vmem>>, %arg3: memref<8x72xbf16, #tpu.memory_space<vmem>>, %arg4: memref<8x1xf32, #tpu.memory_space<vmem>>, %arg5: memref<8x72xbf16, #tpu.memory_space<vmem>>, %arg6: memref<8x1xf32, #tpu.memory_space<vmem>>, %arg7: memref<8x72xbf16, #tpu.memory_space<vmem>>, %arg8: memref<8x1xf32, #tpu.memory_space<vmem>>, %arg9: memref<32x72xbf16, #tpu.memory_space<vmem>>, %arg10: memref<32x1xf32, #tpu.memory_space<vmem>>, %arg11: memref<1x72xbf16, #tpu.memory_space<vmem>>, %arg12: memref<1x1xf32, #tpu.memory_space<vmem>>, %arg13: memref<1x1x1024xf32, #tpu.memory_space<vmem>>, %arg14: memref<32x512xf32, #tpu.memory_space<vmem>>, %arg15: memref<72x1024xbf16, #tpu.memory_space<vmem>>) attributes {dimension_semantics = [#tpu.dimension_semantics<parallel>], iteration_bounds = array<i64: 2>, scalar_prefetch = 0 : i64, scratch_operands = 2 : i64, tpu.core_type = #tpu.core_type<tc>, window_params = [{transform_indices = @transform_0, window_bounds = array<i64: 1, 8, 256>}, {pipeline_mode = #tpu.pipeline_mode<synchronous>, transform_indices = @transform_1, window_bounds = array<i64: 9, 256>}, {pipeline_mode = #tpu.pipeline_mode<synchronous>, transform_indices = @transform_2, window_bounds = array<i64: 8, 72>}, {pipeline_mode = #tpu.pipeline_mode<synchronous>, transform_indices = @transform_3, window_bounds = array<i64: 8, 1>}, {pipeline_mode = #tpu.pipeline_mode<synchronous>, transform_indices = @transform_4, window_bounds = array<i64: 8, 72>}, {pipeline_mode = #tpu.pipeline_mode<synchronous>, transform_indices = @transform_5, window_bounds = array<i64: 8, 1>}, {pipeline_mode = #tpu.pipeline_mode<synchronous>, transform_indices = @transform_6, window_bounds = array<i64: 8, 72>}, {pipeline_mode = #tpu.pipeline_mode<synchronous>, transform_indices = @transform_7, window_bounds = array<i64: 8, 1>}, {pipeline_mode = #tpu.pipeline_mode<synchronous>, transform_indices = @transform_8, window_bounds = array<i64: 32, 72>}, {pipeline_mode = #tpu.pipeline_mode<synchronous>, transform_indices = @transform_9, window_bounds = array<i64: 32, 1>}, {pipeline_mode = #tpu.pipeline_mode<synchronous>, transform_indices = @transform_10, window_bounds = array<i64: 1, 72>}, {pipeline_mode = #tpu.pipeline_mode<synchronous>, transform_indices = @transform_11, window_bounds = array<i64: 1, 1>}, {transform_indices = @transform_12, window_bounds = array<i64: 1, 1, 1024>}]} {
    %cst = arith.constant 0.000000e+00 : f32
    %0 = vector.broadcast %cst : f32 to vector<32x128xf32>
    %c0 = arith.constant 0 : index
    %c0_0 = arith.constant 0 : index
    %1 = vector.load %arg14[%c0, %c0_0] : memref<32x512xf32, #tpu.memory_space<vmem>>, vector<32x128xf32>
    tpu.vector_store %arg14[%c0, %c0_0], %0 {strides = array<i32>} : memref<32x512xf32, #tpu.memory_space<vmem>>, vector<32x128xf32>,
    %c0_1 = arith.constant 0 : index
    %c384 = arith.constant 384 : index
    %2 = vector.load %arg14[%c0_1, %c384] : memref<32x512xf32, #tpu.memory_space<vmem>>, vector<32x128xf32>
    tpu.vector_store %arg14[%c0_1, %c384], %0 {strides = array<i32>} : memref<32x512xf32, #tpu.memory_space<vmem>>, vector<32x128xf32>,
    %c0_2 = arith.constant 0 : index
    %c0_3 = arith.constant 0 : index
    %3 = vector.load %arg2[%c0_2, %c0_3] : memref<9x256xf32, #tpu.memory_space<vmem>>, vector<1x256xf32>
    %4 = vector.shape_cast %3 : vector<1x256xf32> to vector<1x256xf32>
    %5 = vector.broadcast %4 : vector<1x256xf32> to vector<8x256xf32>
    %c1 = arith.constant 1 : index
    %c0_4 = arith.constant 0 : index
    %6 = vector.load %arg2[%c1, %c0_4] : memref<9x256xf32, #tpu.memory_space<vmem>>, vector<1x256xf32>
    %7 = vector.shape_cast %6 : vector<1x256xf32> to vector<1x256xf32>
    %8 = vector.broadcast %7 : vector<1x256xf32> to vector<8x256xf32>
    %c2 = arith.constant 2 : index
    %c0_5 = arith.constant 0 : index
    %9 = vector.load %arg2[%c2, %c0_5] : memref<9x256xf32, #tpu.memory_space<vmem>>, vector<1x256xf32>
    %10 = vector.shape_cast %9 : vector<1x256xf32> to vector<1x256xf32>
    %11 = vector.broadcast %10 : vector<1x256xf32> to vector<8x256xf32>
    %c3 = arith.constant 3 : index
    %c0_6 = arith.constant 0 : index
    %12 = vector.load %arg2[%c3, %c0_6] : memref<9x256xf32, #tpu.memory_space<vmem>>, vector<1x256xf32>
    %13 = vector.shape_cast %12 : vector<1x256xf32> to vector<1x256xf32>
    %14 = vector.broadcast %13 : vector<1x256xf32> to vector<8x256xf32>
    %c5 = arith.constant 5 : index
    %c0_7 = arith.constant 0 : index
    %15 = vector.load %arg2[%c5, %c0_7] : memref<9x256xf32, #tpu.memory_space<vmem>>, vector<1x256xf32>
    %16 = vector.shape_cast %15 : vector<1x256xf32> to vector<1x256xf32>
    %17 = vector.broadcast %16 : vector<1x256xf32> to vector<8x256xf32>
    %c6 = arith.constant 6 : index
    %c0_8 = arith.constant 0 : index
    %18 = vector.load %arg2[%c6, %c0_8] : memref<9x256xf32, #tpu.memory_space<vmem>>, vector<1x256xf32>
    %19 = vector.shape_cast %18 : vector<1x256xf32> to vector<1x256xf32>
    %20 = vector.broadcast %19 : vector<1x256xf32> to vector<8x256xf32>
    %c7 = arith.constant 7 : index
    %c0_9 = arith.constant 0 : index
    %21 = vector.load %arg2[%c7, %c0_9] : memref<9x256xf32, #tpu.memory_space<vmem>>, vector<1x256xf32>
    %22 = vector.shape_cast %21 : vector<1x256xf32> to vector<1x256xf32>
    %23 = vector.broadcast %22 : vector<1x256xf32> to vector<8x256xf32>
    %c8 = arith.constant 8 : index
    %c0_10 = arith.constant 0 : index
    %24 = vector.load %arg2[%c8, %c0_10] : memref<9x256xf32, #tpu.memory_space<vmem>>, vector<1x256xf32>
    %25 = vector.shape_cast %24 : vector<1x256xf32> to vector<1x256xf32>
    %26 = vector.broadcast %25 : vector<1x256xf32> to vector<8x256xf32>
    %c0_11 = arith.constant 0 : index
    %c0_12 = arith.constant 0 : index
    %c0_13 = arith.constant 0 : index
    %27 = vector.load %arg1[%c0_11, %c0_12, %c0_13] : memref<1x8x256xf32, #tpu.memory_space<vmem>>, vector<1x8x256xf32>
    %28 = vector.shape_cast %27 : vector<1x8x256xf32> to vector<8x256xf32>
    %c0_14 = arith.constant 0 : index
    %c0_15 = arith.constant 0 : index
    %29 = vector.load %arg3[%c0_14, %c0_15] : memref<8x72xbf16, #tpu.memory_space<vmem>>, vector<8x72xbf16>
    %c0_16 = arith.constant 0 : index
    %c0_17 = arith.constant 0 : index
    %30 = vector.load %arg4[%c0_16, %c0_17] : memref<8x1xf32, #tpu.memory_space<vmem>>, vector<8x1xf32>
    %c0_18 = arith.constant 0 : index
    %c128 = arith.constant 128 : index
    %31 = vector.load %arg14[%c0_18, %c128] : memref<32x512xf32, #tpu.memory_space<vmem>>, vector<8x256xf32>
    tpu.vector_store %arg14[%c0_18, %c128], %28 {strides = array<i32>} : memref<32x512xf32, #tpu.memory_space<vmem>>, vector<8x256xf32>,
    %c0_19 = arith.constant 0 : index
    %c111 = arith.constant 111 : index
    %32 = vector.load %arg14[%c0_19, %c111] : memref<32x512xf32, #tpu.memory_space<vmem>>, vector<8x256xf32>
    %33 = arith.mulf %32, %5 : vector<8x256xf32>
    %34 = arith.truncf %33 : vector<8x256xf32> to vector<8x256xbf16>
    %c0_20 = arith.constant 0 : index
    %c0_21 = arith.constant 0 : index
    %35 = vector.load %arg15[%c0_20, %c0_21] : memref<72x1024xbf16, #tpu.memory_space<vmem>>, vector<8x256xbf16>
    tpu.vector_store %arg15[%c0_20, %c0_21], %34 {strides = array<i32>} : memref<72x1024xbf16, #tpu.memory_space<vmem>>, vector<8x256xbf16>,
    %c0_22 = arith.constant 0 : index
    %c112 = arith.constant 112 : index
    %36 = vector.load %arg14[%c0_22, %c112] : memref<32x512xf32, #tpu.memory_space<vmem>>, vector<8x256xf32>
    %37 = arith.mulf %36, %8 : vector<8x256xf32>
    %38 = arith.truncf %37 : vector<8x256xf32> to vector<8x256xbf16>
    %c8_23 = arith.constant 8 : index
    %c0_24 = arith.constant 0 : index
    %39 = vector.load %arg15[%c8_23, %c0_24] : memref<72x1024xbf16, #tpu.memory_space<vmem>>, vector<8x256xbf16>
    tpu.vector_store %arg15[%c8_23, %c0_24], %38 {strides = array<i32>} : memref<72x1024xbf16, #tpu.memory_space<vmem>>, vector<8x256xbf16>,
    %c0_25 = arith.constant 0 : index
    %c113 = arith.constant 113 : index
    %40 = vector.load %arg14[%c0_25, %c113] : memref<32x512xf32, #tpu.memory_space<vmem>>, vector<8x256xf32>
    %41 = arith.mulf %40, %11 : vector<8x256xf32>
    %42 = arith.truncf %41 : vector<8x256xf32> to vector<8x256xbf16>
    %c16 = arith.constant 16 : index
    %c0_26 = arith.constant 0 : index
    %43 = vector.load %arg15[%c16, %c0_26] : memref<72x1024xbf16, #tpu.memory_space<vmem>>, vector<8x256xbf16>
    tpu.vector_store %arg15[%c16, %c0_26], %42 {strides = array<i32>} : memref<72x1024xbf16, #tpu.memory_space<vmem>>, vector<8x256xbf16>,
    %c0_27 = arith.constant 0 : index
    %c127 = arith.constant 127 : index
    %44 = vector.load %arg14[%c0_27, %c127] : memref<32x512xf32, #tpu.memory_space<vmem>>, vector<8x256xf32>
    %45 = arith.mulf %44, %14 : vector<8x256xf32>
    %46 = arith.truncf %45 : vector<8x256xf32> to vector<8x256xbf16>
    %c24 = arith.constant 24 : index
    %c0_28 = arith.constant 0 : index
    %47 = vector.load %arg15[%c24, %c0_28] : memref<72x1024xbf16, #tpu.memory_space<vmem>>, vector<8x256xbf16>
    tpu.vector_store %arg15[%c24, %c0_28], %46 {strides = array<i32>} : memref<72x1024xbf16, #tpu.memory_space<vmem>>, vector<8x256xbf16>,
    %c0_29 = arith.constant 0 : index
    %c128_30 = arith.constant 128 : index
    %48 = vector.load %arg14[%c0_29, %c128_30] : memref<32x512xf32, #tpu.memory_space<vmem>>, vector<8x256xf32>
    %49 = arith.truncf %48 : vector<8x256xf32> to vector<8x256xbf16>
    %c32 = arith.constant 32 : index
    %c0_31 = arith.constant 0 : index
    %50 = vector.load %arg15[%c32, %c0_31] : memref<72x1024xbf16, #tpu.memory_space<vmem>>, vector<8x256xbf16>
    tpu.vector_store %arg15[%c32, %c0_31], %49 {strides = array<i32>} : memref<72x1024xbf16, #tpu.memory_space<vmem>>, vector<8x256xbf16>,
    %c0_32 = arith.constant 0 : index
    %c129 = arith.constant 129 : index
    %51 = vector.load %arg14[%c0_32, %c129] : memref<32x512xf32, #tpu.memory_space<vmem>>, vector<8x256xf32>
    %52 = arith.mulf %51, %17 : vector<8x256xf32>
    %53 = arith.truncf %52 : vector<8x256xf32> to vector<8x256xbf16>
    %c40 = arith.constant 40 : index
    %c0_33 = arith.constant 0 : index
    %54 = vector.load %arg15[%c40, %c0_33] : memref<72x1024xbf16, #tpu.memory_space<vmem>>, vector<8x256xbf16>
    tpu.vector_store %arg15[%c40, %c0_33], %53 {strides = array<i32>} : memref<72x1024xbf16, #tpu.memory_space<vmem>>, vector<8x256xbf16>,
    %c0_34 = arith.constant 0 : index
    %c143 = arith.constant 143 : index
    %55 = vector.load %arg14[%c0_34, %c143] : memref<32x512xf32, #tpu.memory_space<vmem>>, vector<8x256xf32>
    %56 = arith.mulf %55, %20 : vector<8x256xf32>
    %57 = arith.truncf %56 : vector<8x256xf32> to vector<8x256xbf16>
    %c48 = arith.constant 48 : index
    %c0_35 = arith.constant 0 : index
    %58 = vector.load %arg15[%c48, %c0_35] : memref<72x1024xbf16, #tpu.memory_space<vmem>>, vector<8x256xbf16>
    tpu.vector_store %arg15[%c48, %c0_35], %57 {strides = array<i32>} : memref<72x1024xbf16, #tpu.memory_space<vmem>>, vector<8x256xbf16>,
    %c0_36 = arith.constant 0 : index
    %c144 = arith.constant 144 : index
    %59 = vector.load %arg14[%c0_36, %c144] : memref<32x512xf32, #tpu.memory_space<vmem>>, vector<8x256xf32>
    %60 = arith.mulf %59, %23 : vector<8x256xf32>
    %61 = arith.truncf %60 : vector<8x256xf32> to vector<8x256xbf16>
    %c56 = arith.constant 56 : index
    %c0_37 = arith.constant 0 : index
    %62 = vector.load %arg15[%c56, %c0_37] : memref<72x1024xbf16, #tpu.memory_space<vmem>>, vector<8x256xbf16>
    tpu.vector_store %arg15[%c56, %c0_37], %61 {strides = array<i32>} : memref<72x1024xbf16, #tpu.memory_space<vmem>>, vector<8x256xbf16>,
    %c0_38 = arith.constant 0 : index
    %c145 = arith.constant 145 : index
    %63 = vector.load %arg14[%c0_38, %c145] : memref<32x512xf32, #tpu.memory_space<vmem>>, vector<8x256xf32>
    %64 = arith.mulf %63, %26 : vector<8x256xf32>
    %65 = arith.truncf %64 : vector<8x256xf32> to vector<8x256xbf16>
    %c64 = arith.constant 64 : index
    %c0_39 = arith.constant 0 : index
    %66 = vector.load %arg15[%c64, %c0_39] : memref<72x1024xbf16, #tpu.memory_space<vmem>>, vector<8x256xbf16>
    tpu.vector_store %arg15[%c64, %c0_39], %65 {strides = array<i32>} : memref<72x1024xbf16, #tpu.memory_space<vmem>>, vector<8x256xbf16>,
    %c0_40 = arith.constant 0 : index
    %c0_41 = arith.constant 0 : index
    %67 = vector.load %arg15[%c0_40, %c0_41] : memref<72x1024xbf16, #tpu.memory_space<vmem>>, vector<72x256xbf16>
    %cst_42 = arith.constant dense<0.000000e+00> : vector<8x256xf32>
    %68 = tpu.matmul %29, %67, %cst_42 {dimension_numbers = #tpu.dot_dimension_numbers<[1], [0], [0], [1], [0, 0, 1, 1], [], []>} : vector<8x72xbf16>, vector<72x256xbf16>, vector<8x256xf32> -> vector<8x256xf32>
    %69 = vector.broadcast %30 : vector<8x1xf32> to vector<8x256xf32>
    %70 = arith.addf %68, %69 : vector<8x256xf32>
    %cst_43 = arith.constant 0.000000e+00 : f32
    %71 = vector.broadcast %cst_43 : f32 to vector<8x256xf32>
    %72 = arith.cmpf ogt, %70, %71 : vector<8x256xf32>
    %cst_44 = arith.constant 0.00999999977 : f32
    %73 = vector.broadcast %cst_44 : f32 to vector<8x256xf32>
    %74 = arith.mulf %73, %70 : vector<8x256xf32>
    %75 = arith.select %72, %70, %74 : vector<8x256xi1>, vector<8x256xf32>
    %c0_45 = arith.constant 0 : index
    %c0_46 = arith.constant 0 : index
    %76 = vector.load %arg5[%c0_45, %c0_46] : memref<8x72xbf16, #tpu.memory_space<vmem>>, vector<8x72xbf16>
    %c0_47 = arith.constant 0 : index
    %c0_48 = arith.constant 0 : index
    %77 = vector.load %arg6[%c0_47, %c0_48] : memref<8x1xf32, #tpu.memory_space<vmem>>, vector<8x1xf32>
    %c0_49 = arith.constant 0 : index
    %c128_50 = arith.constant 128 : index
    %78 = vector.load %arg14[%c0_49, %c128_50] : memref<32x512xf32, #tpu.memory_space<vmem>>, vector<8x256xf32>
    tpu.vector_store %arg14[%c0_49, %c128_50], %75 {strides = array<i32>} : memref<32x512xf32, #tpu.memory_space<vmem>>, vector<8x256xf32>,
    %c0_51 = arith.constant 0 : index
    %c111_52 = arith.constant 111 : index
    %79 = vector.load %arg14[%c0_51, %c111_52] : memref<32x512xf32, #tpu.memory_space<vmem>>, vector<8x256xf32>
    %80 = arith.mulf %79, %5 : vector<8x256xf32>
    %81 = arith.truncf %80 : vector<8x256xf32> to vector<8x256xbf16>
    %c0_53 = arith.constant 0 : index
    %c0_54 = arith.constant 0 : index
    %82 = vector.load %arg15[%c0_53, %c0_54] : memref<72x1024xbf16, #tpu.memory_space<vmem>>, vector<8x256xbf16>
    tpu.vector_store %arg15[%c0_53, %c0_54], %81 {strides = array<i32>} : memref<72x1024xbf16, #tpu.memory_space<vmem>>, vector<8x256xbf16>,
    %c0_55 = arith.constant 0 : index
    %c112_56 = arith.constant 112 : index
    %83 = vector.load %arg14[%c0_55, %c112_56] : memref<32x512xf32, #tpu.memory_space<vmem>>, vector<8x256xf32>
    %84 = arith.mulf %83, %8 : vector<8x256xf32>
    %85 = arith.truncf %84 : vector<8x256xf32> to vector<8x256xbf16>
    %c8_57 = arith.constant 8 : index
    %c0_58 = arith.constant 0 : index
    %86 = vector.load %arg15[%c8_57, %c0_58] : memref<72x1024xbf16, #tpu.memory_space<vmem>>, vector<8x256xbf16>
    tpu.vector_store %arg15[%c8_57, %c0_58], %85 {strides = array<i32>} : memref<72x1024xbf16, #tpu.memory_space<vmem>>, vector<8x256xbf16>,
    %c0_59 = arith.constant 0 : index
    %c113_60 = arith.constant 113 : index
    %87 = vector.load %arg14[%c0_59, %c113_60] : memref<32x512xf32, #tpu.memory_space<vmem>>, vector<8x256xf32>
    %88 = arith.mulf %87, %11 : vector<8x256xf32>
    %89 = arith.truncf %88 : vector<8x256xf32> to vector<8x256xbf16>
    %c16_61 = arith.constant 16 : index
    %c0_62 = arith.constant 0 : index
    %90 = vector.load %arg15[%c16_61, %c0_62] : memref<72x1024xbf16, #tpu.memory_space<vmem>>, vector<8x256xbf16>
    tpu.vector_store %arg15[%c16_61, %c0_62], %89 {strides = array<i32>} : memref<72x1024xbf16, #tpu.memory_space<vmem>>, vector<8x256xbf16>,
    %c0_63 = arith.constant 0 : index
    %c127_64 = arith.constant 127 : index
    %91 = vector.load %arg14[%c0_63, %c127_64] : memref<32x512xf32, #tpu.memory_space<vmem>>, vector<8x256xf32>
    %92 = arith.mulf %91, %14 : vector<8x256xf32>
    %93 = arith.truncf %92 : vector<8x256xf32> to vector<8x256xbf16>
    %c24_65 = arith.constant 24 : index
    %c0_66 = arith.constant 0 : index
    %94 = vector.load %arg15[%c24_65, %c0_66] : memref<72x1024xbf16, #tpu.memory_space<vmem>>, vector<8x256xbf16>
    tpu.vector_store %arg15[%c24_65, %c0_66], %93 {strides = array<i32>} : memref<72x1024xbf16, #tpu.memory_space<vmem>>, vector<8x256xbf16>,
    %c0_67 = arith.constant 0 : index
    %c128_68 = arith.constant 128 : index
    %95 = vector.load %arg14[%c0_67, %c128_68] : memref<32x512xf32, #tpu.memory_space<vmem>>, vector<8x256xf32>
    %96 = arith.truncf %95 : vector<8x256xf32> to vector<8x256xbf16>
    %c32_69 = arith.constant 32 : index
    %c0_70 = arith.constant 0 : index
    %97 = vector.load %arg15[%c32_69, %c0_70] : memref<72x1024xbf16, #tpu.memory_space<vmem>>, vector<8x256xbf16>
    tpu.vector_store %arg15[%c32_69, %c0_70], %96 {strides = array<i32>} : memref<72x1024xbf16, #tpu.memory_space<vmem>>, vector<8x256xbf16>,
    %c0_71 = arith.constant 0 : index
    %c129_72 = arith.constant 129 : index
    %98 = vector.load %arg14[%c0_71, %c129_72] : memref<32x512xf32, #tpu.memory_space<vmem>>, vector<8x256xf32>
    %99 = arith.mulf %98, %17 : vector<8x256xf32>
    %100 = arith.truncf %99 : vector<8x256xf32> to vector<8x256xbf16>
    %c40_73 = arith.constant 40 : index
    %c0_74 = arith.constant 0 : index
    %101 = vector.load %arg15[%c40_73, %c0_74] : memref<72x1024xbf16, #tpu.memory_space<vmem>>, vector<8x256xbf16>
    tpu.vector_store %arg15[%c40_73, %c0_74], %100 {strides = array<i32>} : memref<72x1024xbf16, #tpu.memory_space<vmem>>, vector<8x256xbf16>,
    %c0_75 = arith.constant 0 : index
    %c143_76 = arith.constant 143 : index
    %102 = vector.load %arg14[%c0_75, %c143_76] : memref<32x512xf32, #tpu.memory_space<vmem>>, vector<8x256xf32>
    %103 = arith.mulf %102, %20 : vector<8x256xf32>
    %104 = arith.truncf %103 : vector<8x256xf32> to vector<8x256xbf16>
    %c48_77 = arith.constant 48 : index
    %c0_78 = arith.constant 0 : index
    %105 = vector.load %arg15[%c48_77, %c0_78] : memref<72x1024xbf16, #tpu.memory_space<vmem>>, vector<8x256xbf16>
    tpu.vector_store %arg15[%c48_77, %c0_78], %104 {strides = array<i32>} : memref<72x1024xbf16, #tpu.memory_space<vmem>>, vector<8x256xbf16>,
    %c0_79 = arith.constant 0 : index
    %c144_80 = arith.constant 144 : index
    %106 = vector.load %arg14[%c0_79, %c144_80] : memref<32x512xf32, #tpu.memory_space<vmem>>, vector<8x256xf32>
    %107 = arith.mulf %106, %23 : vector<8x256xf32>
    %108 = arith.truncf %107 : vector<8x256xf32> to vector<8x256xbf16>
    %c56_81 = arith.constant 56 : index
    %c0_82 = arith.constant 0 : index
    %109 = vector.load %arg15[%c56_81, %c0_82] : memref<72x1024xbf16, #tpu.memory_space<vmem>>, vector<8x256xbf16>
    tpu.vector_store %arg15[%c56_81, %c0_82], %108 {strides = array<i32>} : memref<72x1024xbf16, #tpu.memory_space<vmem>>, vector<8x256xbf16>,
    %c0_83 = arith.constant 0 : index
    %c145_84 = arith.constant 145 : index
    %110 = vector.load %arg14[%c0_83, %c145_84] : memref<32x512xf32, #tpu.memory_space<vmem>>, vector<8x256xf32>
    %111 = arith.mulf %110, %26 : vector<8x256xf32>
    %112 = arith.truncf %111 : vector<8x256xf32> to vector<8x256xbf16>
    %c64_85 = arith.constant 64 : index
    %c0_86 = arith.constant 0 : index
    %113 = vector.load %arg15[%c64_85, %c0_86] : memref<72x1024xbf16, #tpu.memory_space<vmem>>, vector<8x256xbf16>
    tpu.vector_store %arg15[%c64_85, %c0_86], %112 {strides = array<i32>} : memref<72x1024xbf16, #tpu.memory_space<vmem>>, vector<8x256xbf16>,
    %c0_87 = arith.constant 0 : index
    %c0_88 = arith.constant 0 : index
    %114 = vector.load %arg15[%c0_87, %c0_88] : memref<72x1024xbf16, #tpu.memory_space<vmem>>, vector<72x256xbf16>
    %cst_89 = arith.constant dense<0.000000e+00> : vector<8x256xf32>
    %115 = tpu.matmul %76, %114, %cst_89 {dimension_numbers = #tpu.dot_dimension_numbers<[1], [0], [0], [1], [0, 0, 1, 1], [], []>} : vector<8x72xbf16>, vector<72x256xbf16>, vector<8x256xf32> -> vector<8x256xf32>
    %116 = vector.broadcast %77 : vector<8x1xf32> to vector<8x256xf32>
    %117 = arith.addf %115, %116 : vector<8x256xf32>
    %cst_90 = arith.constant 0.000000e+00 : f32
    %118 = vector.broadcast %cst_90 : f32 to vector<8x256xf32>
    %119 = arith.cmpf ogt, %117, %118 : vector<8x256xf32>
    %cst_91 = arith.constant 0.00999999977 : f32
    %120 = vector.broadcast %cst_91 : f32 to vector<8x256xf32>
    %121 = arith.mulf %120, %117 : vector<8x256xf32>
    %122 = arith.select %119, %117, %121 : vector<8x256xi1>, vector<8x256xf32>
    %c0_92 = arith.constant 0 : index
    %c0_93 = arith.constant 0 : index
    %123 = vector.load %arg7[%c0_92, %c0_93] : memref<8x72xbf16, #tpu.memory_space<vmem>>, vector<8x72xbf16>
    %c0_94 = arith.constant 0 : index
    %c0_95 = arith.constant 0 : index
    %124 = vector.load %arg8[%c0_94, %c0_95] : memref<8x1xf32, #tpu.memory_space<vmem>>, vector<8x1xf32>
    %c0_96 = arith.constant 0 : index
    %c128_97 = arith.constant 128 : index
    %125 = vector.load %arg14[%c0_96, %c128_97] : memref<32x512xf32, #tpu.memory_space<vmem>>, vector<8x256xf32>
    tpu.vector_store %arg14[%c0_96, %c128_97], %122 {strides = array<i32>} : memref<32x512xf32, #tpu.memory_space<vmem>>, vector<8x256xf32>,
    %c0_98 = arith.constant 0 : index
    %c111_99 = arith.constant 111 : index
    %126 = vector.load %arg14[%c0_98, %c111_99] : memref<32x512xf32, #tpu.memory_space<vmem>>, vector<8x256xf32>
    %127 = arith.mulf %126, %5 : vector<8x256xf32>
    %128 = arith.truncf %127 : vector<8x256xf32> to vector<8x256xbf16>
    %c0_100 = arith.constant 0 : index
    %c0_101 = arith.constant 0 : index
    %129 = vector.load %arg15[%c0_100, %c0_101] : memref<72x1024xbf16, #tpu.memory_space<vmem>>, vector<8x256xbf16>
    tpu.vector_store %arg15[%c0_100, %c0_101], %128 {strides = array<i32>} : memref<72x1024xbf16, #tpu.memory_space<vmem>>, vector<8x256xbf16>,
    %c0_102 = arith.constant 0 : index
    %c112_103 = arith.constant 112 : index
    %130 = vector.load %arg14[%c0_102, %c112_103] : memref<32x512xf32, #tpu.memory_space<vmem>>, vector<8x256xf32>
    %131 = arith.mulf %130, %8 : vector<8x256xf32>
    %132 = arith.truncf %131 : vector<8x256xf32> to vector<8x256xbf16>
    %c8_104 = arith.constant 8 : index
    %c0_105 = arith.constant 0 : index
    %133 = vector.load %arg15[%c8_104, %c0_105] : memref<72x1024xbf16, #tpu.memory_space<vmem>>, vector<8x256xbf16>
    tpu.vector_store %arg15[%c8_104, %c0_105], %132 {strides = array<i32>} : memref<72x1024xbf16, #tpu.memory_space<vmem>>, vector<8x256xbf16>,
    %c0_106 = arith.constant 0 : index
    %c113_107 = arith.constant 113 : index
    %134 = vector.load %arg14[%c0_106, %c113_107] : memref<32x512xf32, #tpu.memory_space<vmem>>, vector<8x256xf32>
    %135 = arith.mulf %134, %11 : vector<8x256xf32>
    %136 = arith.truncf %135 : vector<8x256xf32> to vector<8x256xbf16>
    %c16_108 = arith.constant 16 : index
    %c0_109 = arith.constant 0 : index
    %137 = vector.load %arg15[%c16_108, %c0_109] : memref<72x1024xbf16, #tpu.memory_space<vmem>>, vector<8x256xbf16>
    tpu.vector_store %arg15[%c16_108, %c0_109], %136 {strides = array<i32>} : memref<72x1024xbf16, #tpu.memory_space<vmem>>, vector<8x256xbf16>,
    %c0_110 = arith.constant 0 : index
    %c127_111 = arith.constant 127 : index
    %138 = vector.load %arg14[%c0_110, %c127_111] : memref<32x512xf32, #tpu.memory_space<vmem>>, vector<8x256xf32>
    %139 = arith.mulf %138, %14 : vector<8x256xf32>
    %140 = arith.truncf %139 : vector<8x256xf32> to vector<8x256xbf16>
    %c24_112 = arith.constant 24 : index
    %c0_113 = arith.constant 0 : index
    %141 = vector.load %arg15[%c24_112, %c0_113] : memref<72x1024xbf16, #tpu.memory_space<vmem>>, vector<8x256xbf16>
    tpu.vector_store %arg15[%c24_112, %c0_113], %140 {strides = array<i32>} : memref<72x1024xbf16, #tpu.memory_space<vmem>>, vector<8x256xbf16>,
    %c0_114 = arith.constant 0 : index
    %c128_115 = arith.constant 128 : index
    %142 = vector.load %arg14[%c0_114, %c128_115] : memref<32x512xf32, #tpu.memory_space<vmem>>, vector<8x256xf32>
    %143 = arith.truncf %142 : vector<8x256xf32> to vector<8x256xbf16>
    %c32_116 = arith.constant 32 : index
    %c0_117 = arith.constant 0 : index
    %144 = vector.load %arg15[%c32_116, %c0_117] : memref<72x1024xbf16, #tpu.memory_space<vmem>>, vector<8x256xbf16>
    tpu.vector_store %arg15[%c32_116, %c0_117], %143 {strides = array<i32>} : memref<72x1024xbf16, #tpu.memory_space<vmem>>, vector<8x256xbf16>,
    %c0_118 = arith.constant 0 : index
    %c129_119 = arith.constant 129 : index
    %145 = vector.load %arg14[%c0_118, %c129_119] : memref<32x512xf32, #tpu.memory_space<vmem>>, vector<8x256xf32>
    %146 = arith.mulf %145, %17 : vector<8x256xf32>
    %147 = arith.truncf %146 : vector<8x256xf32> to vector<8x256xbf16>
    %c40_120 = arith.constant 40 : index
    %c0_121 = arith.constant 0 : index
    %148 = vector.load %arg15[%c40_120, %c0_121] : memref<72x1024xbf16, #tpu.memory_space<vmem>>, vector<8x256xbf16>
    tpu.vector_store %arg15[%c40_120, %c0_121], %147 {strides = array<i32>} : memref<72x1024xbf16, #tpu.memory_space<vmem>>, vector<8x256xbf16>,
    %c0_122 = arith.constant 0 : index
    %c143_123 = arith.constant 143 : index
    %149 = vector.load %arg14[%c0_122, %c143_123] : memref<32x512xf32, #tpu.memory_space<vmem>>, vector<8x256xf32>
    %150 = arith.mulf %149, %20 : vector<8x256xf32>
    %151 = arith.truncf %150 : vector<8x256xf32> to vector<8x256xbf16>
    %c48_124 = arith.constant 48 : index
    %c0_125 = arith.constant 0 : index
    %152 = vector.load %arg15[%c48_124, %c0_125] : memref<72x1024xbf16, #tpu.memory_space<vmem>>, vector<8x256xbf16>
    tpu.vector_store %arg15[%c48_124, %c0_125], %151 {strides = array<i32>} : memref<72x1024xbf16, #tpu.memory_space<vmem>>, vector<8x256xbf16>,
    %c0_126 = arith.constant 0 : index
    %c144_127 = arith.constant 144 : index
    %153 = vector.load %arg14[%c0_126, %c144_127] : memref<32x512xf32, #tpu.memory_space<vmem>>, vector<8x256xf32>
    %154 = arith.mulf %153, %23 : vector<8x256xf32>
    %155 = arith.truncf %154 : vector<8x256xf32> to vector<8x256xbf16>
    %c56_128 = arith.constant 56 : index
    %c0_129 = arith.constant 0 : index
    %156 = vector.load %arg15[%c56_128, %c0_129] : memref<72x1024xbf16, #tpu.memory_space<vmem>>, vector<8x256xbf16>
    tpu.vector_store %arg15[%c56_128, %c0_129], %155 {strides = array<i32>} : memref<72x1024xbf16, #tpu.memory_space<vmem>>, vector<8x256xbf16>,
    %c0_130 = arith.constant 0 : index
    %c145_131 = arith.constant 145 : index
    %157 = vector.load %arg14[%c0_130, %c145_131] : memref<32x512xf32, #tpu.memory_space<vmem>>, vector<8x256xf32>
    %158 = arith.mulf %157, %26 : vector<8x256xf32>
    %159 = arith.truncf %158 : vector<8x256xf32> to vector<8x256xbf16>
    %c64_132 = arith.constant 64 : index
    %c0_133 = arith.constant 0 : index
    %160 = vector.load %arg15[%c64_132, %c0_133] : memref<72x1024xbf16, #tpu.memory_space<vmem>>, vector<8x256xbf16>
    tpu.vector_store %arg15[%c64_132, %c0_133], %159 {strides = array<i32>} : memref<72x1024xbf16, #tpu.memory_space<vmem>>, vector<8x256xbf16>,
    %c0_134 = arith.constant 0 : index
    %c0_135 = arith.constant 0 : index
    %161 = vector.load %arg15[%c0_134, %c0_135] : memref<72x1024xbf16, #tpu.memory_space<vmem>>, vector<72x256xbf16>
    %cst_136 = arith.constant dense<0.000000e+00> : vector<8x256xf32>
    %162 = tpu.matmul %123, %161, %cst_136 {dimension_numbers = #tpu.dot_dimension_numbers<[1], [0], [0], [1], [0, 0, 1, 1], [], []>} : vector<8x72xbf16>, vector<72x256xbf16>, vector<8x256xf32> -> vector<8x256xf32>
    %163 = vector.broadcast %124 : vector<8x1xf32> to vector<8x256xf32>
    %164 = arith.addf %162, %163 : vector<8x256xf32>
    %cst_137 = arith.constant 0.000000e+00 : f32
    %165 = vector.broadcast %cst_137 : f32 to vector<8x256xf32>
    %166 = arith.cmpf ogt, %164, %165 : vector<8x256xf32>
    %cst_138 = arith.constant 0.00999999977 : f32
    %167 = vector.broadcast %cst_138 : f32 to vector<8x256xf32>
    %168 = arith.mulf %167, %164 : vector<8x256xf32>
    %169 = arith.select %166, %164, %168 : vector<8x256xi1>, vector<8x256xf32>
    %c0_139 = arith.constant 0 : index
    %c0_140 = arith.constant 0 : index
    %170 = vector.load %arg9[%c0_139, %c0_140] : memref<32x72xbf16, #tpu.memory_space<vmem>>, vector<32x72xbf16>
    %c0_141 = arith.constant 0 : index
    %c0_142 = arith.constant 0 : index
    %171 = vector.load %arg10[%c0_141, %c0_142] : memref<32x1xf32, #tpu.memory_space<vmem>>, vector<32x1xf32>
    %c0_143 = arith.constant 0 : index
    %c128_144 = arith.constant 128 : index
    %172 = vector.load %arg14[%c0_143, %c128_144] : memref<32x512xf32, #tpu.memory_space<vmem>>, vector<8x256xf32>
    tpu.vector_store %arg14[%c0_143, %c128_144], %169 {strides = array<i32>} : memref<32x512xf32, #tpu.memory_space<vmem>>, vector<8x256xf32>,
    %c0_145 = arith.constant 0 : index
    %c111_146 = arith.constant 111 : index
    %173 = vector.load %arg14[%c0_145, %c111_146] : memref<32x512xf32, #tpu.memory_space<vmem>>, vector<8x256xf32>
    %174 = arith.mulf %173, %5 : vector<8x256xf32>
    %175 = arith.truncf %174 : vector<8x256xf32> to vector<8x256xbf16>
    %c0_147 = arith.constant 0 : index
    %c0_148 = arith.constant 0 : index
    %176 = vector.load %arg15[%c0_147, %c0_148] : memref<72x1024xbf16, #tpu.memory_space<vmem>>, vector<8x256xbf16>
    tpu.vector_store %arg15[%c0_147, %c0_148], %175 {strides = array<i32>} : memref<72x1024xbf16, #tpu.memory_space<vmem>>, vector<8x256xbf16>,
    %c0_149 = arith.constant 0 : index
    %c112_150 = arith.constant 112 : index
    %177 = vector.load %arg14[%c0_149, %c112_150] : memref<32x512xf32, #tpu.memory_space<vmem>>, vector<8x256xf32>
    %178 = arith.mulf %177, %8 : vector<8x256xf32>
    %179 = arith.truncf %178 : vector<8x256xf32> to vector<8x256xbf16>
    %c8_151 = arith.constant 8 : index
    %c0_152 = arith.constant 0 : index
    %180 = vector.load %arg15[%c8_151, %c0_152] : memref<72x1024xbf16, #tpu.memory_space<vmem>>, vector<8x256xbf16>
    tpu.vector_store %arg15[%c8_151, %c0_152], %179 {strides = array<i32>} : memref<72x1024xbf16, #tpu.memory_space<vmem>>, vector<8x256xbf16>,
    %c0_153 = arith.constant 0 : index
    %c113_154 = arith.constant 113 : index
    %181 = vector.load %arg14[%c0_153, %c113_154] : memref<32x512xf32, #tpu.memory_space<vmem>>, vector<8x256xf32>
    %182 = arith.mulf %181, %11 : vector<8x256xf32>
    %183 = arith.truncf %182 : vector<8x256xf32> to vector<8x256xbf16>
    %c16_155 = arith.constant 16 : index
    %c0_156 = arith.constant 0 : index
    %184 = vector.load %arg15[%c16_155, %c0_156] : memref<72x1024xbf16, #tpu.memory_space<vmem>>, vector<8x256xbf16>
    tpu.vector_store %arg15[%c16_155, %c0_156], %183 {strides = array<i32>} : memref<72x1024xbf16, #tpu.memory_space<vmem>>, vector<8x256xbf16>,
    %c0_157 = arith.constant 0 : index
    %c127_158 = arith.constant 127 : index
    %185 = vector.load %arg14[%c0_157, %c127_158] : memref<32x512xf32, #tpu.memory_space<vmem>>, vector<8x256xf32>
    %186 = arith.mulf %185, %14 : vector<8x256xf32>
    %187 = arith.truncf %186 : vector<8x256xf32> to vector<8x256xbf16>
    %c24_159 = arith.constant 24 : index
    %c0_160 = arith.constant 0 : index
    %188 = vector.load %arg15[%c24_159, %c0_160] : memref<72x1024xbf16, #tpu.memory_space<vmem>>, vector<8x256xbf16>
    tpu.vector_store %arg15[%c24_159, %c0_160], %187 {strides = array<i32>} : memref<72x1024xbf16, #tpu.memory_space<vmem>>, vector<8x256xbf16>,
    %c0_161 = arith.constant 0 : index
    %c128_162 = arith.constant 128 : index
    %189 = vector.load %arg14[%c0_161, %c128_162] : memref<32x512xf32, #tpu.memory_space<vmem>>, vector<8x256xf32>
    %190 = arith.truncf %189 : vector<8x256xf32> to vector<8x256xbf16>
    %c32_163 = arith.constant 32 : index
    %c0_164 = arith.constant 0 : index
    %191 = vector.load %arg15[%c32_163, %c0_164] : memref<72x1024xbf16, #tpu.memory_space<vmem>>, vector<8x256xbf16>
    tpu.vector_store %arg15[%c32_163, %c0_164], %190 {strides = array<i32>} : memref<72x1024xbf16, #tpu.memory_space<vmem>>, vector<8x256xbf16>,
    %c0_165 = arith.constant 0 : index
    %c129_166 = arith.constant 129 : index
    %192 = vector.load %arg14[%c0_165, %c129_166] : memref<32x512xf32, #tpu.memory_space<vmem>>, vector<8x256xf32>
    %193 = arith.mulf %192, %17 : vector<8x256xf32>
    %194 = arith.truncf %193 : vector<8x256xf32> to vector<8x256xbf16>
    %c40_167 = arith.constant 40 : index
    %c0_168 = arith.constant 0 : index
    %195 = vector.load %arg15[%c40_167, %c0_168] : memref<72x1024xbf16, #tpu.memory_space<vmem>>, vector<8x256xbf16>
    tpu.vector_store %arg15[%c40_167, %c0_168], %194 {strides = array<i32>} : memref<72x1024xbf16, #tpu.memory_space<vmem>>, vector<8x256xbf16>,
    %c0_169 = arith.constant 0 : index
    %c143_170 = arith.constant 143 : index
    %196 = vector.load %arg14[%c0_169, %c143_170] : memref<32x512xf32, #tpu.memory_space<vmem>>, vector<8x256xf32>
    %197 = arith.mulf %196, %20 : vector<8x256xf32>
    %198 = arith.truncf %197 : vector<8x256xf32> to vector<8x256xbf16>
    %c48_171 = arith.constant 48 : index
    %c0_172 = arith.constant 0 : index
    %199 = vector.load %arg15[%c48_171, %c0_172] : memref<72x1024xbf16, #tpu.memory_space<vmem>>, vector<8x256xbf16>
    tpu.vector_store %arg15[%c48_171, %c0_172], %198 {strides = array<i32>} : memref<72x1024xbf16, #tpu.memory_space<vmem>>, vector<8x256xbf16>,
    %c0_173 = arith.constant 0 : index
    %c144_174 = arith.constant 144 : index
    %200 = vector.load %arg14[%c0_173, %c144_174] : memref<32x512xf32, #tpu.memory_space<vmem>>, vector<8x256xf32>
    %201 = arith.mulf %200, %23 : vector<8x256xf32>
    %202 = arith.truncf %201 : vector<8x256xf32> to vector<8x256xbf16>
    %c56_175 = arith.constant 56 : index
    %c0_176 = arith.constant 0 : index
    %203 = vector.load %arg15[%c56_175, %c0_176] : memref<72x1024xbf16, #tpu.memory_space<vmem>>, vector<8x256xbf16>
    tpu.vector_store %arg15[%c56_175, %c0_176], %202 {strides = array<i32>} : memref<72x1024xbf16, #tpu.memory_space<vmem>>, vector<8x256xbf16>,
    %c0_177 = arith.constant 0 : index
    %c145_178 = arith.constant 145 : index
    %204 = vector.load %arg14[%c0_177, %c145_178] : memref<32x512xf32, #tpu.memory_space<vmem>>, vector<8x256xf32>
    %205 = arith.mulf %204, %26 : vector<8x256xf32>
    %206 = arith.truncf %205 : vector<8x256xf32> to vector<8x256xbf16>
    %c64_179 = arith.constant 64 : index
    %c0_180 = arith.constant 0 : index
    %207 = vector.load %arg15[%c64_179, %c0_180] : memref<72x1024xbf16, #tpu.memory_space<vmem>>, vector<8x256xbf16>
    tpu.vector_store %arg15[%c64_179, %c0_180], %206 {strides = array<i32>} : memref<72x1024xbf16, #tpu.memory_space<vmem>>, vector<8x256xbf16>,
    %c0_181 = arith.constant 0 : index
    %c0_182 = arith.constant 0 : index
    %208 = vector.load %arg15[%c0_181, %c0_182] : memref<72x1024xbf16, #tpu.memory_space<vmem>>, vector<72x256xbf16>
    %cst_183 = arith.constant dense<0.000000e+00> : vector<32x256xf32>
    %209 = tpu.matmul %170, %208, %cst_183 {dimension_numbers = #tpu.dot_dimension_numbers<[1], [0], [0], [1], [0, 0, 1, 1], [], []>} : vector<32x72xbf16>, vector<72x256xbf16>, vector<32x256xf32> -> vector<32x256xf32>
    %210 = vector.broadcast %171 : vector<32x1xf32> to vector<32x256xf32>
    %211 = arith.addf %209, %210 : vector<32x256xf32>
    %cst_184 = arith.constant 0.000000e+00 : f32
    %212 = vector.broadcast %cst_184 : f32 to vector<32x256xf32>
    %213 = arith.cmpf ogt, %211, %212 : vector<32x256xf32>
    %cst_185 = arith.constant 0.00999999977 : f32
    %214 = vector.broadcast %cst_185 : f32 to vector<32x256xf32>
    %215 = arith.mulf %214, %211 : vector<32x256xf32>
    %216 = arith.select %213, %211, %215 : vector<32x256xi1>, vector<32x256xf32>
    %c0_186 = arith.constant 0 : index
    %c0_187 = arith.constant 0 : index
    %217 = vector.load %arg11[%c0_186, %c0_187] : memref<1x72xbf16, #tpu.memory_space<vmem>>, vector<1x72xbf16>
    %c0_188 = arith.constant 0 : index
    %c0_189 = arith.constant 0 : index
    %218 = vector.load %arg12[%c0_188, %c0_189] : memref<1x1xf32, #tpu.memory_space<vmem>>, vector<1x1xf32>
    %c0_190 = arith.constant 0 : index
    %c128_191 = arith.constant 128 : index
    %219 = vector.load %arg14[%c0_190, %c128_191] : memref<32x512xf32, #tpu.memory_space<vmem>>, vector<32x256xf32>
    tpu.vector_store %arg14[%c0_190, %c128_191], %216 {strides = array<i32>} : memref<32x512xf32, #tpu.memory_space<vmem>>, vector<32x256xf32>,
    %c24_192 = arith.constant 24 : index
    %c111_193 = arith.constant 111 : index
    %220 = vector.load %arg14[%c24_192, %c111_193] : memref<32x512xf32, #tpu.memory_space<vmem>>, vector<8x256xf32>
    %221 = arith.mulf %220, %5 : vector<8x256xf32>
    %222 = arith.truncf %221 : vector<8x256xf32> to vector<8x256xbf16>
    %c0_194 = arith.constant 0 : index
    %c0_195 = arith.constant 0 : index
    %223 = vector.load %arg15[%c0_194, %c0_195] : memref<72x1024xbf16, #tpu.memory_space<vmem>>, vector<8x256xbf16>
    tpu.vector_store %arg15[%c0_194, %c0_195], %222 {strides = array<i32>} : memref<72x1024xbf16, #tpu.memory_space<vmem>>, vector<8x256xbf16>,
    %c16_196 = arith.constant 16 : index
    %c112_197 = arith.constant 112 : index
    %224 = vector.load %arg14[%c16_196, %c112_197] : memref<32x512xf32, #tpu.memory_space<vmem>>, vector<8x256xf32>
    %225 = arith.mulf %224, %8 : vector<8x256xf32>
    %226 = arith.truncf %225 : vector<8x256xf32> to vector<8x256xbf16>
    %c8_198 = arith.constant 8 : index
    %c0_199 = arith.constant 0 : index
    %227 = vector.load %arg15[%c8_198, %c0_199] : memref<72x1024xbf16, #tpu.memory_space<vmem>>, vector<8x256xbf16>
    tpu.vector_store %arg15[%c8_198, %c0_199], %226 {strides = array<i32>} : memref<72x1024xbf16, #tpu.memory_space<vmem>>, vector<8x256xbf16>,
    %c24_200 = arith.constant 24 : index
    %c112_201 = arith.constant 112 : index
    %228 = vector.load %arg14[%c24_200, %c112_201] : memref<32x512xf32, #tpu.memory_space<vmem>>, vector<8x256xf32>
    %229 = arith.mulf %228, %8 : vector<8x256xf32>
    %230 = arith.truncf %229 : vector<8x256xf32> to vector<8x256xbf16>
    %c16_202 = arith.constant 16 : index
    %c0_203 = arith.constant 0 : index
    %231 = vector.load %arg15[%c16_202, %c0_203] : memref<72x1024xbf16, #tpu.memory_space<vmem>>, vector<8x256xbf16>
    tpu.vector_store %arg15[%c16_202, %c0_203], %230 {strides = array<i32>} : memref<72x1024xbf16, #tpu.memory_space<vmem>>, vector<8x256xbf16>,
    %c8_204 = arith.constant 8 : index
    %c127_205 = arith.constant 127 : index
    %232 = vector.load %arg14[%c8_204, %c127_205] : memref<32x512xf32, #tpu.memory_space<vmem>>, vector<8x256xf32>
    %233 = arith.mulf %232, %14 : vector<8x256xf32>
    %234 = arith.truncf %233 : vector<8x256xf32> to vector<8x256xbf16>
    %c24_206 = arith.constant 24 : index
    %c0_207 = arith.constant 0 : index
    %235 = vector.load %arg15[%c24_206, %c0_207] : memref<72x1024xbf16, #tpu.memory_space<vmem>>, vector<8x256xbf16>
    tpu.vector_store %arg15[%c24_206, %c0_207], %234 {strides = array<i32>} : memref<72x1024xbf16, #tpu.memory_space<vmem>>, vector<8x256xbf16>,
    %c0_208 = arith.constant 0 : index
    %c128_209 = arith.constant 128 : index
    %236 = vector.load %arg14[%c0_208, %c128_209] : memref<32x512xf32, #tpu.memory_space<vmem>>, vector<8x256xf32>
    %237 = arith.truncf %236 : vector<8x256xf32> to vector<8x256xbf16>
    %c32_210 = arith.constant 32 : index
    %c0_211 = arith.constant 0 : index
    %238 = vector.load %arg15[%c32_210, %c0_211] : memref<72x1024xbf16, #tpu.memory_space<vmem>>, vector<8x256xbf16>
    tpu.vector_store %arg15[%c32_210, %c0_211], %237 {strides = array<i32>} : memref<72x1024xbf16, #tpu.memory_space<vmem>>, vector<8x256xbf16>,
    %c8_212 = arith.constant 8 : index
    %c128_213 = arith.constant 128 : index
    %239 = vector.load %arg14[%c8_212, %c128_213] : memref<32x512xf32, #tpu.memory_space<vmem>>, vector<8x256xf32>
    %240 = arith.truncf %239 : vector<8x256xf32> to vector<8x256xbf16>
    %c40_214 = arith.constant 40 : index
    %c0_215 = arith.constant 0 : index
    %241 = vector.load %arg15[%c40_214, %c0_215] : memref<72x1024xbf16, #tpu.memory_space<vmem>>, vector<8x256xbf16>
    tpu.vector_store %arg15[%c40_214, %c0_215], %240 {strides = array<i32>} : memref<72x1024xbf16, #tpu.memory_space<vmem>>, vector<8x256xbf16>,
    %c24_216 = arith.constant 24 : index
    %c127_217 = arith.constant 127 : index
    %242 = vector.load %arg14[%c24_216, %c127_217] : memref<32x512xf32, #tpu.memory_space<vmem>>, vector<8x256xf32>
    %243 = arith.mulf %242, %14 : vector<8x256xf32>
    %244 = arith.truncf %243 : vector<8x256xf32> to vector<8x256xbf16>
    %c48_218 = arith.constant 48 : index
    %c0_219 = arith.constant 0 : index
    %245 = vector.load %arg15[%c48_218, %c0_219] : memref<72x1024xbf16, #tpu.memory_space<vmem>>, vector<8x256xbf16>
    tpu.vector_store %arg15[%c48_218, %c0_219], %244 {strides = array<i32>} : memref<72x1024xbf16, #tpu.memory_space<vmem>>, vector<8x256xbf16>,
    %c16_220 = arith.constant 16 : index
    %c128_221 = arith.constant 128 : index
    %246 = vector.load %arg14[%c16_220, %c128_221] : memref<32x512xf32, #tpu.memory_space<vmem>>, vector<8x256xf32>
    %247 = arith.truncf %246 : vector<8x256xf32> to vector<8x256xbf16>
    %c56_222 = arith.constant 56 : index
    %c0_223 = arith.constant 0 : index
    %248 = vector.load %arg15[%c56_222, %c0_223] : memref<72x1024xbf16, #tpu.memory_space<vmem>>, vector<8x256xbf16>
    tpu.vector_store %arg15[%c56_222, %c0_223], %247 {strides = array<i32>} : memref<72x1024xbf16, #tpu.memory_space<vmem>>, vector<8x256xbf16>,
    %c24_224 = arith.constant 24 : index
    %c128_225 = arith.constant 128 : index
    %249 = vector.load %arg14[%c24_224, %c128_225] : memref<32x512xf32, #tpu.memory_space<vmem>>, vector<8x256xf32>
    %250 = arith.truncf %249 : vector<8x256xf32> to vector<8x256xbf16>
    %c64_226 = arith.constant 64 : index
    %c0_227 = arith.constant 0 : index
    %251 = vector.load %arg15[%c64_226, %c0_227] : memref<72x1024xbf16, #tpu.memory_space<vmem>>, vector<8x256xbf16>
    tpu.vector_store %arg15[%c64_226, %c0_227], %250 {strides = array<i32>} : memref<72x1024xbf16, #tpu.memory_space<vmem>>, vector<8x256xbf16>,
    %c16_228 = arith.constant 16 : index
    %c112_229 = arith.constant 112 : index
    %252 = vector.load %arg14[%c16_228, %c112_229] : memref<32x512xf32, #tpu.memory_space<vmem>>, vector<8x256xf32>
    %253 = arith.mulf %252, %8 : vector<8x256xf32>
    %254 = arith.truncf %253 : vector<8x256xf32> to vector<8x256xbf16>
    %c0_230 = arith.constant 0 : index
    %c256 = arith.constant 256 : index
    %255 = vector.load %arg15[%c0_230, %c256] : memref<72x1024xbf16, #tpu.memory_space<vmem>>, vector<8x256xbf16>
    tpu.vector_store %arg15[%c0_230, %c256], %254 {strides = array<i32>} : memref<72x1024xbf16, #tpu.memory_space<vmem>>, vector<8x256xbf16>,
    %c24_231 = arith.constant 24 : index
    %c112_232 = arith.constant 112 : index
    %256 = vector.load %arg14[%c24_231, %c112_232] : memref<32x512xf32, #tpu.memory_space<vmem>>, vector<8x256xf32>
    %257 = arith.mulf %256, %8 : vector<8x256xf32>
    %258 = arith.truncf %257 : vector<8x256xf32> to vector<8x256xbf16>
    %c8_233 = arith.constant 8 : index
    %c256_234 = arith.constant 256 : index
    %259 = vector.load %arg15[%c8_233, %c256_234] : memref<72x1024xbf16, #tpu.memory_space<vmem>>, vector<8x256xbf16>
    tpu.vector_store %arg15[%c8_233, %c256_234], %258 {strides = array<i32>} : memref<72x1024xbf16, #tpu.memory_space<vmem>>, vector<8x256xbf16>,
    %c16_235 = arith.constant 16 : index
    %c113_236 = arith.constant 113 : index
    %260 = vector.load %arg14[%c16_235, %c113_236] : memref<32x512xf32, #tpu.memory_space<vmem>>, vector<8x256xf32>
    %261 = arith.mulf %260, %11 : vector<8x256xf32>
    %262 = arith.truncf %261 : vector<8x256xf32> to vector<8x256xbf16>
    %c16_237 = arith.constant 16 : index
    %c256_238 = arith.constant 256 : index
    %263 = vector.load %arg15[%c16_237, %c256_238] : memref<72x1024xbf16, #tpu.memory_space<vmem>>, vector<8x256xbf16>
    tpu.vector_store %arg15[%c16_237, %c256_238], %262 {strides = array<i32>} : memref<72x1024xbf16, #tpu.memory_space<vmem>>, vector<8x256xbf16>,
    %c0_239 = arith.constant 0 : index
    %c128_240 = arith.constant 128 : index
    %264 = vector.load %arg14[%c0_239, %c128_240] : memref<32x512xf32, #tpu.memory_space<vmem>>, vector<8x256xf32>
    %265 = arith.truncf %264 : vector<8x256xf32> to vector<8x256xbf16>
    %c24_241 = arith.constant 24 : index
    %c256_242 = arith.constant 256 : index
    %266 = vector.load %arg15[%c24_241, %c256_242] : memref<72x1024xbf16, #tpu.memory_space<vmem>>, vector<8x256xbf16>
    tpu.vector_store %arg15[%c24_241, %c256_242], %265 {strides = array<i32>} : memref<72x1024xbf16, #tpu.memory_space<vmem>>, vector<8x256xbf16>,
    %c8_243 = arith.constant 8 : index
    %c128_244 = arith.constant 128 : index
    %267 = vector.load %arg14[%c8_243, %c128_244] : memref<32x512xf32, #tpu.memory_space<vmem>>, vector<8x256xf32>
    %268 = arith.truncf %267 : vector<8x256xf32> to vector<8x256xbf16>
    %c32_245 = arith.constant 32 : index
    %c256_246 = arith.constant 256 : index
    %269 = vector.load %arg15[%c32_245, %c256_246] : memref<72x1024xbf16, #tpu.memory_space<vmem>>, vector<8x256xbf16>
    tpu.vector_store %arg15[%c32_245, %c256_246], %268 {strides = array<i32>} : memref<72x1024xbf16, #tpu.memory_space<vmem>>, vector<8x256xbf16>,
    %c0_247 = arith.constant 0 : index
    %c129_248 = arith.constant 129 : index
    %270 = vector.load %arg14[%c0_247, %c129_248] : memref<32x512xf32, #tpu.memory_space<vmem>>, vector<8x256xf32>
    %271 = arith.mulf %270, %17 : vector<8x256xf32>
    %272 = arith.truncf %271 : vector<8x256xf32> to vector<8x256xbf16>
    %c40_249 = arith.constant 40 : index
    %c256_250 = arith.constant 256 : index
    %273 = vector.load %arg15[%c40_249, %c256_250] : memref<72x1024xbf16, #tpu.memory_space<vmem>>, vector<8x256xbf16>
    tpu.vector_store %arg15[%c40_249, %c256_250], %272 {strides = array<i32>} : memref<72x1024xbf16, #tpu.memory_space<vmem>>, vector<8x256xbf16>,
    %c16_251 = arith.constant 16 : index
    %c128_252 = arith.constant 128 : index
    %274 = vector.load %arg14[%c16_251, %c128_252] : memref<32x512xf32, #tpu.memory_space<vmem>>, vector<8x256xf32>
    %275 = arith.truncf %274 : vector<8x256xf32> to vector<8x256xbf16>
    %c48_253 = arith.constant 48 : index
    %c256_254 = arith.constant 256 : index
    %276 = vector.load %arg15[%c48_253, %c256_254] : memref<72x1024xbf16, #tpu.memory_space<vmem>>, vector<8x256xbf16>
    tpu.vector_store %arg15[%c48_253, %c256_254], %275 {strides = array<i32>} : memref<72x1024xbf16, #tpu.memory_space<vmem>>, vector<8x256xbf16>,
    %c24_255 = arith.constant 24 : index
    %c128_256 = arith.constant 128 : index
    %277 = vector.load %arg14[%c24_255, %c128_256] : memref<32x512xf32, #tpu.memory_space<vmem>>, vector<8x256xf32>
    %278 = arith.truncf %277 : vector<8x256xf32> to vector<8x256xbf16>
    %c56_257 = arith.constant 56 : index
    %c256_258 = arith.constant 256 : index
    %279 = vector.load %arg15[%c56_257, %c256_258] : memref<72x1024xbf16, #tpu.memory_space<vmem>>, vector<8x256xbf16>
    tpu.vector_store %arg15[%c56_257, %c256_258], %278 {strides = array<i32>} : memref<72x1024xbf16, #tpu.memory_space<vmem>>, vector<8x256xbf16>,
    %c16_259 = arith.constant 16 : index
    %c129_260 = arith.constant 129 : index
    %280 = vector.load %arg14[%c16_259, %c129_260] : memref<32x512xf32, #tpu.memory_space<vmem>>, vector<8x256xf32>
    %281 = arith.mulf %280, %17 : vector<8x256xf32>
    %282 = arith.truncf %281 : vector<8x256xf32> to vector<8x256xbf16>
    %c64_261 = arith.constant 64 : index
    %c256_262 = arith.constant 256 : index
    %283 = vector.load %arg15[%c64_261, %c256_262] : memref<72x1024xbf16, #tpu.memory_space<vmem>>, vector<8x256xbf16>
    tpu.vector_store %arg15[%c64_261, %c256_262], %282 {strides = array<i32>} : memref<72x1024xbf16, #tpu.memory_space<vmem>>, vector<8x256xbf16>,
    %c8_263 = arith.constant 8 : index
    %c127_264 = arith.constant 127 : index
    %284 = vector.load %arg14[%c8_263, %c127_264] : memref<32x512xf32, #tpu.memory_space<vmem>>, vector<8x256xf32>
    %285 = arith.mulf %284, %14 : vector<8x256xf32>
    %286 = arith.truncf %285 : vector<8x256xf32> to vector<8x256xbf16>
    %c0_265 = arith.constant 0 : index
    %c512 = arith.constant 512 : index
    %287 = vector.load %arg15[%c0_265, %c512] : memref<72x1024xbf16, #tpu.memory_space<vmem>>, vector<8x256xbf16>
    tpu.vector_store %arg15[%c0_265, %c512], %286 {strides = array<i32>} : memref<72x1024xbf16, #tpu.memory_space<vmem>>, vector<8x256xbf16>,
    %c0_266 = arith.constant 0 : index
    %c128_267 = arith.constant 128 : index
    %288 = vector.load %arg14[%c0_266, %c128_267] : memref<32x512xf32, #tpu.memory_space<vmem>>, vector<8x256xf32>
    %289 = arith.truncf %288 : vector<8x256xf32> to vector<8x256xbf16>
    %c8_268 = arith.constant 8 : index
    %c512_269 = arith.constant 512 : index
    %290 = vector.load %arg15[%c8_268, %c512_269] : memref<72x1024xbf16, #tpu.memory_space<vmem>>, vector<8x256xbf16>
    tpu.vector_store %arg15[%c8_268, %c512_269], %289 {strides = array<i32>} : memref<72x1024xbf16, #tpu.memory_space<vmem>>, vector<8x256xbf16>,
    %c8_270 = arith.constant 8 : index
    %c128_271 = arith.constant 128 : index
    %291 = vector.load %arg14[%c8_270, %c128_271] : memref<32x512xf32, #tpu.memory_space<vmem>>, vector<8x256xf32>
    %292 = arith.truncf %291 : vector<8x256xf32> to vector<8x256xbf16>
    %c16_272 = arith.constant 16 : index
    %c512_273 = arith.constant 512 : index
    %293 = vector.load %arg15[%c16_272, %c512_273] : memref<72x1024xbf16, #tpu.memory_space<vmem>>, vector<8x256xbf16>
    tpu.vector_store %arg15[%c16_272, %c512_273], %292 {strides = array<i32>} : memref<72x1024xbf16, #tpu.memory_space<vmem>>, vector<8x256xbf16>,
    %c24_274 = arith.constant 24 : index
    %c127_275 = arith.constant 127 : index
    %294 = vector.load %arg14[%c24_274, %c127_275] : memref<32x512xf32, #tpu.memory_space<vmem>>, vector<8x256xf32>
    %295 = arith.mulf %294, %14 : vector<8x256xf32>
    %296 = arith.truncf %295 : vector<8x256xf32> to vector<8x256xbf16>
    %c24_276 = arith.constant 24 : index
    %c512_277 = arith.constant 512 : index
    %297 = vector.load %arg15[%c24_276, %c512_277] : memref<72x1024xbf16, #tpu.memory_space<vmem>>, vector<8x256xbf16>
    tpu.vector_store %arg15[%c24_276, %c512_277], %296 {strides = array<i32>} : memref<72x1024xbf16, #tpu.memory_space<vmem>>, vector<8x256xbf16>,
    %c16_278 = arith.constant 16 : index
    %c128_279 = arith.constant 128 : index
    %298 = vector.load %arg14[%c16_278, %c128_279] : memref<32x512xf32, #tpu.memory_space<vmem>>, vector<8x256xf32>
    %299 = arith.truncf %298 : vector<8x256xf32> to vector<8x256xbf16>
    %c32_280 = arith.constant 32 : index
    %c512_281 = arith.constant 512 : index
    %300 = vector.load %arg15[%c32_280, %c512_281] : memref<72x1024xbf16, #tpu.memory_space<vmem>>, vector<8x256xbf16>
    tpu.vector_store %arg15[%c32_280, %c512_281], %299 {strides = array<i32>} : memref<72x1024xbf16, #tpu.memory_space<vmem>>, vector<8x256xbf16>,
    %c24_282 = arith.constant 24 : index
    %c128_283 = arith.constant 128 : index
    %301 = vector.load %arg14[%c24_282, %c128_283] : memref<32x512xf32, #tpu.memory_space<vmem>>, vector<8x256xf32>
    %302 = arith.truncf %301 : vector<8x256xf32> to vector<8x256xbf16>
    %c40_284 = arith.constant 40 : index
    %c512_285 = arith.constant 512 : index
    %303 = vector.load %arg15[%c40_284, %c512_285] : memref<72x1024xbf16, #tpu.memory_space<vmem>>, vector<8x256xbf16>
    tpu.vector_store %arg15[%c40_284, %c512_285], %302 {strides = array<i32>} : memref<72x1024xbf16, #tpu.memory_space<vmem>>, vector<8x256xbf16>,
    %c8_286 = arith.constant 8 : index
    %c143_287 = arith.constant 143 : index
    %304 = vector.load %arg14[%c8_286, %c143_287] : memref<32x512xf32, #tpu.memory_space<vmem>>, vector<8x256xf32>
    %305 = arith.mulf %304, %20 : vector<8x256xf32>
    %306 = arith.truncf %305 : vector<8x256xf32> to vector<8x256xbf16>
    %c48_288 = arith.constant 48 : index
    %c512_289 = arith.constant 512 : index
    %307 = vector.load %arg15[%c48_288, %c512_289] : memref<72x1024xbf16, #tpu.memory_space<vmem>>, vector<8x256xbf16>
    tpu.vector_store %arg15[%c48_288, %c512_289], %306 {strides = array<i32>} : memref<72x1024xbf16, #tpu.memory_space<vmem>>, vector<8x256xbf16>,
    %c0_290 = arith.constant 0 : index
    %c144_291 = arith.constant 144 : index
    %308 = vector.load %arg14[%c0_290, %c144_291] : memref<32x512xf32, #tpu.memory_space<vmem>>, vector<8x256xf32>
    %309 = arith.mulf %308, %23 : vector<8x256xf32>
    %310 = arith.truncf %309 : vector<8x256xf32> to vector<8x256xbf16>
    %c56_292 = arith.constant 56 : index
    %c512_293 = arith.constant 512 : index
    %311 = vector.load %arg15[%c56_292, %c512_293] : memref<72x1024xbf16, #tpu.memory_space<vmem>>, vector<8x256xbf16>
    tpu.vector_store %arg15[%c56_292, %c512_293], %310 {strides = array<i32>} : memref<72x1024xbf16, #tpu.memory_space<vmem>>, vector<8x256xbf16>,
    %c8_294 = arith.constant 8 : index
    %c144_295 = arith.constant 144 : index
    %312 = vector.load %arg14[%c8_294, %c144_295] : memref<32x512xf32, #tpu.memory_space<vmem>>, vector<8x256xf32>
    %313 = arith.mulf %312, %23 : vector<8x256xf32>
    %314 = arith.truncf %313 : vector<8x256xf32> to vector<8x256xbf16>
    %c64_296 = arith.constant 64 : index
    %c512_297 = arith.constant 512 : index
    %315 = vector.load %arg15[%c64_296, %c512_297] : memref<72x1024xbf16, #tpu.memory_space<vmem>>, vector<8x256xbf16>
    tpu.vector_store %arg15[%c64_296, %c512_297], %314 {strides = array<i32>} : memref<72x1024xbf16, #tpu.memory_space<vmem>>, vector<8x256xbf16>,
    %c0_298 = arith.constant 0 : index
    %c128_299 = arith.constant 128 : index
    %316 = vector.load %arg14[%c0_298, %c128_299] : memref<32x512xf32, #tpu.memory_space<vmem>>, vector<8x256xf32>
    %317 = arith.truncf %316 : vector<8x256xf32> to vector<8x256xbf16>
    %c0_300 = arith.constant 0 : index
    %c768 = arith.constant 768 : index
    %318 = vector.load %arg15[%c0_300, %c768] : memref<72x1024xbf16, #tpu.memory_space<vmem>>, vector<8x256xbf16>
    tpu.vector_store %arg15[%c0_300, %c768], %317 {strides = array<i32>} : memref<72x1024xbf16, #tpu.memory_space<vmem>>, vector<8x256xbf16>,
    %c8_301 = arith.constant 8 : index
    %c128_302 = arith.constant 128 : index
    %319 = vector.load %arg14[%c8_301, %c128_302] : memref<32x512xf32, #tpu.memory_space<vmem>>, vector<8x256xf32>
    %320 = arith.truncf %319 : vector<8x256xf32> to vector<8x256xbf16>
    %c8_303 = arith.constant 8 : index
    %c768_304 = arith.constant 768 : index
    %321 = vector.load %arg15[%c8_303, %c768_304] : memref<72x1024xbf16, #tpu.memory_space<vmem>>, vector<8x256xbf16>
    tpu.vector_store %arg15[%c8_303, %c768_304], %320 {strides = array<i32>} : memref<72x1024xbf16, #tpu.memory_space<vmem>>, vector<8x256xbf16>,
    %c0_305 = arith.constant 0 : index
    %c129_306 = arith.constant 129 : index
    %322 = vector.load %arg14[%c0_305, %c129_306] : memref<32x512xf32, #tpu.memory_space<vmem>>, vector<8x256xf32>
    %323 = arith.mulf %322, %17 : vector<8x256xf32>
    %324 = arith.truncf %323 : vector<8x256xf32> to vector<8x256xbf16>
    %c16_307 = arith.constant 16 : index
    %c768_308 = arith.constant 768 : index
    %325 = vector.load %arg15[%c16_307, %c768_308] : memref<72x1024xbf16, #tpu.memory_space<vmem>>, vector<8x256xbf16>
    tpu.vector_store %arg15[%c16_307, %c768_308], %324 {strides = array<i32>} : memref<72x1024xbf16, #tpu.memory_space<vmem>>, vector<8x256xbf16>,
    %c16_309 = arith.constant 16 : index
    %c128_310 = arith.constant 128 : index
    %326 = vector.load %arg14[%c16_309, %c128_310] : memref<32x512xf32, #tpu.memory_space<vmem>>, vector<8x256xf32>
    %327 = arith.truncf %326 : vector<8x256xf32> to vector<8x256xbf16>
    %c24_311 = arith.constant 24 : index
    %c768_312 = arith.constant 768 : index
    %328 = vector.load %arg15[%c24_311, %c768_312] : memref<72x1024xbf16, #tpu.memory_space<vmem>>, vector<8x256xbf16>
    tpu.vector_store %arg15[%c24_311, %c768_312], %327 {strides = array<i32>} : memref<72x1024xbf16, #tpu.memory_space<vmem>>, vector<8x256xbf16>,
    %c24_313 = arith.constant 24 : index
    %c128_314 = arith.constant 128 : index
    %329 = vector.load %arg14[%c24_313, %c128_314] : memref<32x512xf32, #tpu.memory_space<vmem>>, vector<8x256xf32>
    %330 = arith.truncf %329 : vector<8x256xf32> to vector<8x256xbf16>
    %c32_315 = arith.constant 32 : index
    %c768_316 = arith.constant 768 : index
    %331 = vector.load %arg15[%c32_315, %c768_316] : memref<72x1024xbf16, #tpu.memory_space<vmem>>, vector<8x256xbf16>
    tpu.vector_store %arg15[%c32_315, %c768_316], %330 {strides = array<i32>} : memref<72x1024xbf16, #tpu.memory_space<vmem>>, vector<8x256xbf16>,
    %c16_317 = arith.constant 16 : index
    %c129_318 = arith.constant 129 : index
    %332 = vector.load %arg14[%c16_317, %c129_318] : memref<32x512xf32, #tpu.memory_space<vmem>>, vector<8x256xf32>
    %333 = arith.mulf %332, %17 : vector<8x256xf32>
    %334 = arith.truncf %333 : vector<8x256xf32> to vector<8x256xbf16>
    %c40_319 = arith.constant 40 : index
    %c768_320 = arith.constant 768 : index
    %335 = vector.load %arg15[%c40_319, %c768_320] : memref<72x1024xbf16, #tpu.memory_space<vmem>>, vector<8x256xbf16>
    tpu.vector_store %arg15[%c40_319, %c768_320], %334 {strides = array<i32>} : memref<72x1024xbf16, #tpu.memory_space<vmem>>, vector<8x256xbf16>,
    %c0_321 = arith.constant 0 : index
    %c144_322 = arith.constant 144 : index
    %336 = vector.load %arg14[%c0_321, %c144_322] : memref<32x512xf32, #tpu.memory_space<vmem>>, vector<8x256xf32>
    %337 = arith.mulf %336, %23 : vector<8x256xf32>
    %338 = arith.truncf %337 : vector<8x256xf32> to vector<8x256xbf16>
    %c48_323 = arith.constant 48 : index
    %c768_324 = arith.constant 768 : index
    %339 = vector.load %arg15[%c48_323, %c768_324] : memref<72x1024xbf16, #tpu.memory_space<vmem>>, vector<8x256xbf16>
    tpu.vector_store %arg15[%c48_323, %c768_324], %338 {strides = array<i32>} : memref<72x1024xbf16, #tpu.memory_space<vmem>>, vector<8x256xbf16>,
    %c8_325 = arith.constant 8 : index
    %c144_326 = arith.constant 144 : index
    %340 = vector.load %arg14[%c8_325, %c144_326] : memref<32x512xf32, #tpu.memory_space<vmem>>, vector<8x256xf32>
    %341 = arith.mulf %340, %23 : vector<8x256xf32>
    %342 = arith.truncf %341 : vector<8x256xf32> to vector<8x256xbf16>
    %c56_327 = arith.constant 56 : index
    %c768_328 = arith.constant 768 : index
    %343 = vector.load %arg15[%c56_327, %c768_328] : memref<72x1024xbf16, #tpu.memory_space<vmem>>, vector<8x256xbf16>
    tpu.vector_store %arg15[%c56_327, %c768_328], %342 {strides = array<i32>} : memref<72x1024xbf16, #tpu.memory_space<vmem>>, vector<8x256xbf16>,
    %c0_329 = arith.constant 0 : index
    %c145_330 = arith.constant 145 : index
    %344 = vector.load %arg14[%c0_329, %c145_330] : memref<32x512xf32, #tpu.memory_space<vmem>>, vector<8x256xf32>
    %345 = arith.mulf %344, %26 : vector<8x256xf32>
    %346 = arith.truncf %345 : vector<8x256xf32> to vector<8x256xbf16>
    %c64_331 = arith.constant 64 : index
    %c768_332 = arith.constant 768 : index
    %347 = vector.load %arg15[%c64_331, %c768_332] : memref<72x1024xbf16, #tpu.memory_space<vmem>>, vector<8x256xbf16>
    tpu.vector_store %arg15[%c64_331, %c768_332], %346 {strides = array<i32>} : memref<72x1024xbf16, #tpu.memory_space<vmem>>, vector<8x256xbf16>,
    %c0_333 = arith.constant 0 : index
    %c0_334 = arith.constant 0 : index
    %348 = vector.load %arg15[%c0_333, %c0_334] : memref<72x1024xbf16, #tpu.memory_space<vmem>>, vector<72x1024xbf16>
    %cst_335 = arith.constant dense<0.000000e+00> : vector<1x1024xf32>
    %349 = tpu.matmul %217, %348, %cst_335 {dimension_numbers = #tpu.dot_dimension_numbers<[1], [0], [0], [1], [0, 0, 1, 1], [], []>} : vector<1x72xbf16>, vector<72x1024xbf16>, vector<1x1024xf32> -> vector<1x1024xf32>
    %350 = vector.broadcast %218 : vector<1x1xf32> to vector<1x1024xf32>
    %351 = arith.addf %349, %350 : vector<1x1024xf32>
    %c0_336 = arith.constant 0 : index
    %c0_337 = arith.constant 0 : index
    %c0_338 = arith.constant 0 : index
    %352 = vector.load %arg13[%c0_336, %c0_337, %c0_338] : memref<1x1x1024xf32, #tpu.memory_space<vmem>>, vector<1x1x1024xf32>
    %353 = vector.shape_cast %352 : vector<1x1x1024xf32> to vector<1x1024xf32>
    %354 = vector.shape_cast %351 : vector<1x1024xf32> to vector<1x1x1024xf32>
    tpu.vector_store %arg13[%c0_336, %c0_337, %c0_338], %354 {strides = array<i32>} : memref<1x1x1024xf32, #tpu.memory_space<vmem>>, vector<1x1x1024xf32>,
    return
  }
  func.func @transform_0(%arg0: i32) -> (i32, i32, i32) {
    %c0_i32 = arith.constant 0 : i32
    %c0_i32_0 = arith.constant 0 : i32
    %c0_i32_1 = arith.constant 0 : i32
    return %arg0, %c0_i32, %c0_i32_0 : i32, i32, i32
  }
  func.func @transform_1(%arg0: i32) -> (i32, i32) {
    %c0_i32 = arith.constant 0 : i32
    %c0_i32_0 = arith.constant 0 : i32
    %c0_i32_1 = arith.constant 0 : i32
    return %c0_i32, %c0_i32_0 : i32, i32
  }
  func.func @transform_2(%arg0: i32) -> (i32, i32) {
    %c0_i32 = arith.constant 0 : i32
    %c0_i32_0 = arith.constant 0 : i32
    %c0_i32_1 = arith.constant 0 : i32
    return %c0_i32, %c0_i32_0 : i32, i32
  }
  func.func @transform_3(%arg0: i32) -> (i32, i32) {
    %c0_i32 = arith.constant 0 : i32
    %c0_i32_0 = arith.constant 0 : i32
    %c0_i32_1 = arith.constant 0 : i32
    return %c0_i32, %c0_i32_0 : i32, i32
  }
  func.func @transform_4(%arg0: i32) -> (i32, i32) {
    %c0_i32 = arith.constant 0 : i32
    %c0_i32_0 = arith.constant 0 : i32
    %c0_i32_1 = arith.constant 0 : i32
    return %c0_i32, %c0_i32_0 : i32, i32
  }
  func.func @transform_5(%arg0: i32) -> (i32, i32) {
    %c0_i32 = arith.constant 0 : i32
    %c0_i32_0 = arith.constant 0 : i32
    %c0_i32_1 = arith.constant 0 : i32
    return %c0_i32, %c0_i32_0 : i32, i32
  }
  func.func @transform_6(%arg0: i32) -> (i32, i32) {
    %c0_i32 = arith.constant 0 : i32
    %c0_i32_0 = arith.constant 0 : i32
    %c0_i32_1 = arith.constant 0 : i32
    return %c0_i32, %c0_i32_0 : i32, i32
  }
  func.func @transform_7(%arg0: i32) -> (i32, i32) {
    %c0_i32 = arith.constant 0 : i32
    %c0_i32_0 = arith.constant 0 : i32
    %c0_i32_1 = arith.constant 0 : i32
    return %c0_i32, %c0_i32_0 : i32, i32
  }
  func.func @transform_8(%arg0: i32) -> (i32, i32) {
    %c0_i32 = arith.constant 0 : i32
    %c0_i32_0 = arith.constant 0 : i32
    %c0_i32_1 = arith.constant 0 : i32
    return %c0_i32, %c0_i32_0 : i32, i32
  }
  func.func @transform_9(%arg0: i32) -> (i32, i32) {
    %c0_i32 = arith.constant 0 : i32
    %c0_i32_0 = arith.constant 0 : i32
    %c0_i32_1 = arith.constant 0 : i32
    return %c0_i32, %c0_i32_0 : i32, i32
  }
  func.func @transform_10(%arg0: i32) -> (i32, i32) {
    %c0_i32 = arith.constant 0 : i32
    %c0_i32_0 = arith.constant 0 : i32
    %c0_i32_1 = arith.constant 0 : i32
    return %c0_i32, %c0_i32_0 : i32, i32
  }
  func.func @transform_11(%arg0: i32) -> (i32, i32) {
    %c0_i32 = arith.constant 0 : i32
    %c0_i32_0 = arith.constant 0 : i32
    %c0_i32_1 = arith.constant 0 : i32
    return %c0_i32, %c0_i32_0 : i32, i32
  }
  func.func @transform_12(%arg0: i32) -> (i32, i32, i32) {
    %c0_i32 = arith.constant 0 : i32
    %c0_i32_0 = arith.constant 0 : i32
    %c0_i32_1 = arith.constant 0 : i32
    return %arg0, %c0_i32, %c0_i32_0 : i32, i32, i32
  }
}

</mosaic_0001>

<bundles_post_ra>
// kernel: scnn_forward_pallas.1
= control target key start
LH: loop header
LB: loop body
LE: loop exit
PB: predicated region body
PF: predicated region fallthrough
CT: control target
= control target key end

     0   :  { %s3776_s23 = smov 0   ;;  %s4505_s0 = inlined_call_operand.vmem [shape: f32[2,8,256], index: 0, kind: input, shape index: {}]   ;;  %s4506_s1 = inlined_call_operand.vmem [shape: f32[9,256], index: 1, kind: input, shape index: {}]   ;;  %s4507_s2 = inlined_call_operand.vmem [shape: bf16[8,72], index: 2, kind: input, shape index: {}]   ;;  %s4508_s3 = inlined_call_operand.vmem [shape: f32[8,1], index: 3, kind: input, shape index: {}]   ;;  %s4509_s4 = inlined_call_operand.vmem [shape: bf16[8,72], index: 4, kind: input, shape index: {}]   ;;  %s4510_s5 = inlined_call_operand.vmem [shape: f32[8,1], index: 5, kind: input, shape index: {}]   ;;  %s4511_s6 = inlined_call_operand.vmem [shape: bf16[8,72], index: 6, kind: input, shape index: {}]   ;;  %s4512_s7 = inlined_call_operand.vmem [shape: f32[8,1], index: 7, kind: input, shape index: {}]   ;;  %s4513_s8 = inlined_call_operand.vmem [shape: bf16[32,72], index: 8, kind: input, shape index: {}]   ;;  %s4514_s9 = inlined_call_operand.vmem [shape: f32[32,1], index: 9, kind: input, shape index: {}]   ;;  %s4515_s10 = inlined_call_operand.vmem [shape: bf16[1,72], index: 10, kind: input, shape index: {}]   ;;  %s4516_s11 = inlined_call_operand.<no memory space> [shape: f32[1,1], index: 11, kind: input, shape index: {}]   ;;  %s4517_s12 = inlined_call_operand.vmem [shape: f32[2,1,1024], index: 12, kind: output, shape index: {}]  }
   0x1   :  { %v17_v0 = vstv %s4516_s11 }
   0x2   :  { %18 = vst [vmem:[#allocation4] sm:$0x1] %v17_v0 }
   0x3 LB: > { %s3297_s24 = sadd.s32 4294967295, %s3696_s23   ;;  %p3301_p0 = scmp.ge.s32.totalorder %s3696_s23, 1  ;;  %s3696_s23 = sphi %s3776_s23, %s24_s23  }
   0x4   : > { %p364_p1 = scmp.lt.s32.totalorder %s3696_s23, 3 }
   0x6   : > { %p365_p2 = pnand %p3301_p0, %p364_p1 }
   0x7   : > { %v425_v1 = vlaneseq (!%p365_p2)  ;;  %v3305_v3 = vld [vmem:[%s4506_s1 + $0x1] ss:$8 sm:$0x3] (!%p365_p2)  ;;  %v423_v4 = vld [vmem:[%s4506_s1] ss:$8 sm:$0x3] (!%p365_p2) }
   0x8   : > { %368 = sbr.rel (%p365_p2) target bundleno = 2063 (0x80f), region = 68  ;;  %s3698_s28 = smov (!%p365_p2), 112   ;;  %v3306_v11 = vld [vmem:[%s4506_s1 + $0x2] ss:$8 sm:$0x3] (!%p365_p2)  ;;  %vm523_vm0 = vcmask (!%p365_p2), 908288  }
   0x9   : > { %v3784_v2 = vshrl.u32 (!%p365_p2), %v425_v1, 7  ;;  %s3699_s29 = smov (!%p365_p2), 111   ;;  %v3307_v14 = vld [vmem:[%s4506_s1 + $0x3] ss:$8 sm:$0x3] (!%p365_p2)  ;;  %s3700_s16 = smov (!%p365_p2), 113  }
   0xa   : > { %v3308_v17 = vld [vmem:[%s4506_s1 + $0x5] ss:$8 sm:$0x3] (!%p365_p2)  ;;  %s3701_s19 = smov (!%p365_p2), 127   ;;  %s3702_s22 = smov (!%p365_p2), 1   ;;  %vm561_vm1 = vcmask (!%p365_p2), 916480  }
   0xb   : > { %v3793_v5 = vsub.s32 (!%p365_p2), 0, %v3784_v2  ;;  %v431_v6 = vsub.s32 (!%p365_p2), 1, %v3784_v2  ;;  %v3309_v20 = vld [vmem:[%s4506_s1 + $0x6] ss:$8 sm:$0x3] (!%p365_p2)  ;;  %s3703_s26 = smov (!%p365_p2), 15  }
   0xc   : > { %v3310_v23 = vld [vmem:[%s4506_s1 + $0x7] ss:$8 sm:$0x3] (!%p365_p2)  ;;  %v3311_v26 = vld [vmem:[%s4506_s1 + $0x10] ss:$8 sm:$0x3] (!%p365_p2) }
   0xd   : > { %v439_v7 = vrot.slane (!%p365_p2), %v3305_v3, %v3793_v5  ;;  %v428_v8 = vrot.slane (!%p365_p2), %v423_v4, %v3793_v5  ;;  %v443_v9 = vrot.slane (!%p365_p2), %v3305_v3, %v431_v6  ;;  %v432_v10 = vrot.slane (!%p365_p2), %v423_v4, %v431_v6  ;;  %s3704_s13 = smov (!%p365_p2), 16   ;;  %s3705_s14 = smov (!%p365_p2), 17  }
   0xe   : > { %v454_v12 = vrot.slane (!%p365_p2), %v3306_v11, %v431_v6  ;;  %v450_v13 = vrot.slane (!%p365_p2), %v3306_v11, %v3793_v5  ;;  %v465_v15 = vrot.slane (!%p365_p2), %v3307_v14, %v431_v6  ;;  %v461_v16 = vrot.slane (!%p365_p2), %v3307_v14, %v3793_v5  ;;  %p405_p3 = scmp.lt.s32.totalorder (!%p365_p2), %s3297_s24, 1 }
   0xf   : > { %557 = vrot.lane.b32.xlu1 %v439_v7, %s3698_s28  ;;  %519 = vrot.lane.b32.xlu0 %v428_v8, %s3699_s29  ;;  %v476_v18 = vrot.slane %v3308_v17, %v431_v6  ;;  %v472_v19 = vrot.slane %v3308_v17, %v3793_v5  ;;  %v487_v21 = vrot.slane %v3309_v20, %v431_v6  ;;  %vm598_vm2 = vcmask 924672  }
  0x10   : > { %v483_v22 = vrot.slane %v3309_v20, %v3793_v5  ;;  %v498_v24 = vrot.slane %v3310_v23, %v431_v6  ;;  %v494_v25 = vrot.slane %v3310_v23, %v3793_v5  ;;  %v509_v27 = vrot.slane %v3311_v26, %v431_v6  ;;  %s4519_s24 = smov (!%p405_p3, %s3297_s24), 1 }
  0x11   : > { %v505_v28 = vrot.slane %v3311_v26, %v3793_v5  ;;  %s3537_s15 = sshll.u32 %s4519_s24, 4  ;;  %vm635_vm3 = vcmask 1039360   ;;  %vm661_vm4 = vcmask 7168   ;;  %vm624_vm5 = vcmask 121856  }
  0x12   : > { %s409_s20 = scalar_lea.vmem %s4505_s0, %s3537_s15  ;;  %vm587_vm6 = vcmask 130048   ;;  %vm550_vm7 = vcmask 138240   ;;  %vm548_vm8 = vcmask 1043456   ;;  %vm883_vm9 = vcmask 588800  }
  0x13   : > { %559 = vrot.lane.b32.xlu1 %v443_v9, %s3698_s28  ;;  %521 = vrot.lane.b32.xlu0 %v432_v10, %s3699_s29  ;;  %v3848_v31 = vld [vmem:[%s409_s20 + $0x8] sm:$0xff]  ;;  %v3850_v32 = vld [vmem:[%s409_s20] sm:$0xff] }
  0x14   : > { %v3909_v61 = vpack.c.bf16 %v3848_v31, %v3850_v32 }
  0x17   : > { %596 = vrot.lane.b32.xlu1 %v454_v12, %s3700_s16  ;;  %594 = vrot.lane.b32.xlu0 %v450_v13, %s3700_s16 }
  0x1b   : > { %633 = vrot.lane.b32.xlu1 %v465_v15, %s3701_s19  ;;  %631 = vrot.lane.b32.xlu0 %v461_v16, %s3701_s19 }
  0x1f   : > { %681 = vrot.lane.b32.xlu1 %v476_v18, %s3702_s22  ;;  %679 = vrot.lane.b32.xlu0 %v472_v19, %s3702_s22 }
  0x23   : > { %718 = vrot.lane.b32.xlu1 %v487_v21, %s3703_s26  ;;  %716 = vrot.lane.b32.xlu0 %v483_v22, %s3703_s26 }
  0x27   : > { %755 = vrot.lane.b32.xlu1 %v498_v24, %s3704_s13  ;;  %753 = vrot.lane.b32.xlu0 %v494_v25, %s3704_s13 }
  0x2b   : > { %792 = vrot.lane.b32.xlu1 %v509_v27, %s3705_s14  ;;  %790 = vrot.lane.b32.xlu0 %v505_v28, %s3705_s14 }
  0x81   : > { %v558_v29 = vpop.permute.xlu1 %557  ;;  %v520_v30 = vpop.permute.xlu0 %519 }
  0x82   : > { %v3868_v39 = vmul.f32 0.0, %v520_v30  ;;  %v3872_v42 = vmul.f32 0.0, %v558_v29 }
  0x85   : > { %v3852_v33 = vpop.permute.xlu1 %559  ;;  %v3854_v34 = vpop.permute.xlu0 %521 }
  0x86   : > { %v530_v35 = vmul.f32 %v3854_v34, %v3848_v31  ;;  %v3860_v36 = vsel %vm523_vm0, %v520_v30, %v3854_v34  ;;  %v568_v37 = vmul.f32 %v3852_v33, %v3848_v31  ;;  %v3866_v38 = vsel %vm561_vm1, %v558_v29, %v3852_v33 }
  0x87   : > { %v529_v40 = vmul.f32 %v3860_v36, %v3850_v32  ;;  %v567_v46 = vmul.f32 %v3866_v38, %v3850_v32 }
  0x88   : > { %v3539_v41 = vpack.c.bf16 %v530_v35, %v530_v35  ;;  %v3541_v48 = vpack.c.bf16 %v568_v37, %v568_v37 }
  0x89   : > { %v3538_v43 = vpack.c.bf16 %v529_v40, %v3868_v39  ;;  %v3875_v44 = vpop.permute.xlu1 %596  ;;  %v595_v45 = vpop.permute.xlu0 %594  ;;  %v3540_v52 = vpack.c.bf16 %v567_v46, %v3872_v42  ;;  %v3706_v40 = vmov 0  }
  0x8a   : > { %544 = vrot.lane.b32.xlu1 %v3539_v41, %s3705_s14  ;;  %v3882_v47 = vsel %vm598_vm2, %v595_v45, %v3875_v44  ;;  %v605_v49 = vmul.f32 %v3875_v44, %v3848_v31  ;;  %v3887_v50 = vmul.f32 0.0, %v595_v45  ;;  %926 = vmatprep.mubr.bf16.mxu0 %v3706_v40 }
  0x8b   : > { %542 = vrot.lane.b32.xlu0 %v3538_v43, %s3705_s14  ;;  %v604_v51 = vmul.f32 %v3882_v47, %v3850_v32  ;;  %1272 = vmatprep.mubr.bf16.mxu1 %v3706_v40 }
  0x8c   : > { %v3543_v56 = vpack.c.bf16 %v605_v49, %v605_v49  ;;  %3686 = vset.pattern.permute.xlu0 %v3706_v40  ;;  %3687 = vset.pattern.permute.xlu1 %v3706_v40 }
  0x8d   : > { %v3892_v53 = vpop.permute.xlu1 %633  ;;  %v632_v54 = vpop.permute.xlu0 %631  ;;  %v3542_v59 = vpack.c.bf16 %v604_v51, %v3887_v50 }
  0x8e   : > { %582 = vrot.lane.b32.xlu1 %v3541_v48, %s3704_s13  ;;  %v3897_v55 = vsel %vm635_vm3, %v632_v54, %v3892_v53  ;;  %v642_v57 = vmul.f32 %v3892_v53, %v3848_v31  ;;  %v3902_v58 = vmul.f32 0.0, %v632_v54 }
  0x8f   : > { %580 = vrot.lane.b32.xlu0 %v3540_v52, %s3704_s13  ;;  %v641_v60 = vmul.f32 %v3897_v55, %v3850_v32 }
  0x90   : > { %v3545_v1 = vpack.c.bf16 %v642_v57, %v642_v57 }
  0x91   : > { %v682_v62 = vpop.permute.xlu1 %681  ;;  %v3911_v63 = vpop.permute.xlu0 %679  ;;  %v3544_v4 = vpack.c.bf16 %v641_v60, %v3902_v58 }
  0x92   : > { %619 = vrot.lane.b32.xlu1 %v3543_v56, %s3703_s26  ;;  %v690_v0 = vmul.f32 0.0, %v682_v62  ;;  %v3916_v3 = vsel %vm661_vm4, %v3911_v63, %v682_v62  ;;  %v688_v6 = vmul.f32 %v3911_v63, %v3850_v32 }
  0x93   : > { %617 = vrot.lane.b32.xlu0 %v3542_v59, %s3703_s26  ;;  %v689_v7 = vmul.f32 %v3916_v3, %v3848_v31 }
  0x94   : > { %v3926_v10 = vpack.c.bf16 %v690_v0, %v690_v0 }
  0x95   : > { %v719_v8 = vpop.permute.xlu1 %718  ;;  %v3924_v9 = vpop.permute.xlu0 %716  ;;  %v3547_v13 = vpack.c.bf16 %v689_v7, %v688_v6 }
  0x96   : > { %656 = vrot.lane.b32.xlu1 %v3545_v1, %s3702_s22  ;;  %v727_v11 = vmul.f32 0.0, %v719_v8  ;;  %v3931_v12 = vsel %vm624_vm5, %v3924_v9, %v719_v8  ;;  %v725_v14 = vmul.f32 %v3924_v9, %v3850_v32 }
  0x97   : > { %654 = vrot.lane.b32.xlu0 %v3544_v4, %s3702_s22  ;;  %v726_v15 = vmul.f32 %v3931_v12, %v3848_v31 }
  0x98   : > { %v3940_v18 = vpack.c.bf16 %v727_v11, %v727_v11 }
  0x99   : > { %v756_v16 = vpop.permute.xlu1 %755  ;;  %v3938_v17 = vpop.permute.xlu0 %753  ;;  %v3549_v21 = vpack.c.bf16 %v726_v15, %v725_v14 }
  0x9a   : > { %704 = vrot.lane.b32.xlu1 %v3926_v10, %s3701_s19  ;;  %v764_v19 = vmul.f32 0.0, %v756_v16  ;;  %v3946_v20 = vsel %vm587_vm6, %v3938_v17, %v756_v16  ;;  %v762_v22 = vmul.f32 %v3938_v17, %v3850_v32 }
  0x9b   : > { %702 = vrot.lane.b32.xlu0 %v3547_v13, %s3701_s19  ;;  %v763_v23 = vmul.f32 %v3946_v20, %v3848_v31 }
  0x9c   : > { %v3955_v26 = vpack.c.bf16 %v764_v19, %v764_v19 }
  0x9d   : > { %v793_v24 = vpop.permute.xlu1 %792  ;;  %v3953_v25 = vpop.permute.xlu0 %790  ;;  %v3551_v29 = vpack.c.bf16 %v763_v23, %v762_v22 }
  0x9e   : > { %741 = vrot.lane.b32.xlu1 %v3940_v18, %s3700_s16  ;;  %v801_v27 = vmul.f32 0.0, %v793_v24  ;;  %v3961_v28 = vsel %vm550_vm7, %v3953_v25, %v793_v24  ;;  %v799_v30 = vmul.f32 %v3953_v25, %v3850_v32 }
  0x9f   : > { %739 = vrot.lane.b32.xlu0 %v3549_v21, %s3700_s16  ;;  %v800_v35 = vmul.f32 %v3961_v28, %v3848_v31  ;;  %v513_v31 = vld [vmem:[%s4508_s3] sm:$0xff] }
  0xa0   : > { %v3968_v37 = vpack.c.bf16 %v801_v27, %v801_v27 }
  0xa1   : > { %v3553_v41 = vpack.c.bf16 %v800_v35, %v799_v30 }
  0xa2   : > { %778 = vrot.lane.b32.xlu1 %v3955_v26, %s3698_s28 }
  0xa3   : > { %776 = vrot.lane.b32.xlu0 %v3551_v29, %s3698_s28 }
  0xa6   : > { %815 = vrot.lane.b32.xlu1 %v3968_v37, %s3699_s29 }
  0xa7   : > { %813 = vrot.lane.b32.xlu0 %v3553_v41, %s3699_s29 }
  0xaa   : > { %1083 = vrot.lane.b32.xlu1 %v3926_v10, %s3701_s19 }
  0xab   : > { %835 = vperm.xlu0 %3686, %v513_v31  }
  0xfc   : > { %v545_v32 = vpop.permute.xlu1 %544 }
  0xfd   : > { %v543_v43 = vpop.permute.xlu0 %542  ;;  %v547_v45 = vrot.slane %v545_v32, 4 }
  0xfe   : > { %v546_v46 = vrot.slane %v543_v43, 4 }
 0x100   : > { %v583_v48 = vpop.permute.xlu1 %582  ;;  %v549_v54 = vsel %vm548_vm8, %v546_v46, %v547_v45 }
 0x101   : > { %v585_v49 = vrot.slane %v583_v48, 4  ;;  %v581_v51 = vpop.permute.xlu0 %580  ;;  %v551_v60 = vsel %vm550_vm7, %v543_v43, %v549_v54 }
 0x102   : > { %v584_v52 = vrot.slane %v581_v51, 4 }
 0x104   : > { %v620_v56 = vpop.permute.xlu1 %619  ;;  %v586_v57 = vsel %vm548_vm8, %v584_v52, %v585_v49 }
 0x105   : > { %v618_v59 = vpop.permute.xlu0 %617  ;;  %v588_v62 = vsel %vm587_vm6, %v581_v51, %v586_v57  ;;  %v622_v0 = vrot.slane %v620_v56, 4 }
 0x106   : > { %v621_v1 = vrot.slane %v618_v59, 4  ;;  %v3330_v4 = vcombine.high %v551_v60, %v588_v62  ;;  %v3329_v6 = vcombine.low %v551_v60, %v588_v62 }
 0x108   : > { %v657_v7 = vpop.permute.xlu1 %656  ;;  %894 = vmatprep.subr.bf16.mxu0 %v3330_v4  ;;  %v623_v13 = vsel %vm548_vm8, %v621_v1, %v622_v0 }
 0x109   : > { %v659_v8 = vrot.slane %v657_v7, 4  ;;  %895 = vmatpush1.bf16.msra.mxu0 %v3329_v6  ;;  %v655_v11 = vpop.permute.xlu0 %654  ;;  %v625_v19 = vsel %vm624_vm5, %v618_v59, %v623_v13 }
 0x10a   : > { %v658_v14 = vrot.slane %v655_v11, 4 }
 0x10c   : > { %v660_v15 = vsel %vm548_vm8, %v658_v14, %v659_v8  ;;  %v705_v16 = vpop.permute.xlu1 %704  ;;  %v512_v14 = vld [vmem:[%s4507_s2] sm:$0xf] }
 0x10d   : > { %v662_v21 = vsel %vm661_vm4, %v655_v11, %v660_v15  ;;  %v707_v22 = vrot.slane %v705_v16, 4  ;;  %v703_v23 = vpop.permute.xlu0 %702 }
 0x10e   : > { %v706_v24 = vrot.slane %v703_v23, 4  ;;  %v3332_v27 = vcombine.high %v625_v19, %v662_v21  ;;  %v3331_v29 = vcombine.low %v625_v19, %v662_v21 }
 0x110   : > { %v708_v30 = vsel %vm548_vm8, %v706_v24, %v707_v22  ;;  %v742_v35 = vpop.permute.xlu1 %741  ;;  %896 = vmatprep.subr.bf16.mxu0 %v3332_v27 }
 0x111   : > { %v710_v41 = vsel %vm635_vm3, %v703_v23, %v708_v30  ;;  %897 = vmatpush1.bf16.msra.mxu0 %v3331_v29  ;;  %v740_v31 = vpop.permute.xlu0 %739  ;;  %v744_v32 = vrot.slane %v742_v35, 4 }
 0x112   : > { %v743_v43 = vrot.slane %v740_v31, 4  ;;  %v3334_v45 = vcombine.high %v3909_v61, %v710_v41  ;;  %v3333_v46 = vcombine.low %v3909_v61, %v710_v41 }
 0x114   : > { %v779_v48 = vpop.permute.xlu1 %778  ;;  %898 = vmatprep.subr.bf16.mxu0 %v3334_v45  ;;  %v745_v52 = vsel %vm548_vm8, %v743_v43, %v744_v32 }
 0x115   : > { %v781_v49 = vrot.slane %v779_v48, 4  ;;  %899 = vmatpush1.bf16.msra.mxu0 %v3333_v46  ;;  %v777_v51 = vpop.permute.xlu0 %776  ;;  %v747_v59 = vsel %vm598_vm2, %v740_v31, %v745_v52 }
 0x116   : > { %v780_v54 = vrot.slane %v777_v51, 4 }
 0x118   : > { %v782_v56 = vsel %vm548_vm8, %v780_v54, %v781_v49  ;;  %v816_v57 = vpop.permute.xlu1 %815 }
 0x119   : > { %v784_v60 = vsel %vm561_vm1, %v777_v51, %v782_v56  ;;  %v818_v62 = vrot.slane %v816_v57, 4  ;;  %v814_v0 = vpop.permute.xlu0 %813 }
 0x11a   : > { %v817_v1 = vrot.slane %v814_v0, 4  ;;  %v3336_v4 = vcombine.high %v747_v59, %v784_v60  ;;  %v3335_v61 = vcombine.low %v747_v59, %v784_v60 }
 0x11c   : > { %v819_v6 = vsel %vm548_vm8, %v817_v1, %v818_v62  ;;  %900 = vmatprep.subr.bf16.mxu0 %v3336_v4 }
 0x11d   : > { %v821_v7 = vsel %vm523_vm0, %v814_v0, %v819_v6  ;;  %901 = vmatpush1.bf16.msra.mxu0 %v3335_v61 }
 0x11e   : > { %v3337_v8 = vcombine.low %v821_v7, %v821_v7  ;;  %v3338_v11 = vcombine.high %v821_v7, %v821_v7 }
 0x120   : > { %3339 = vmatprep.subr.msk.bf16.mxu0 %vm548_vm8, %v3338_v11  ;;  %v889_v13 = vsel %vm548_vm8, %v3337_v8, 0 }
 0x121   : > { %903 = vmatpush1.bf16.msra.mxu0 %v889_v13 }
 0x124   : > { %3340 = vmatmul.mubr.msk.bf16.vlgmr.msra.gmra.mrb[0].mxu0 %vm883_vm9, %v512_v14 }
 0x125   : > { %1618 = vmatprep.mubr.bf16.mxu0 %v3706_v40 }
 0x12a   : > { %v836_v15 = vpop.permute.xlu0 %835 }
 0x1f7   : > { %v928_v16 = vpop.f32.mrb[0].mxu0 }
 0x1f8   : > { %v929_v19 = vadd.f32 %v928_v16, %v836_v15  ;;  %v930_v21 = vpop.f32.mrb[1].mxu0 }
 0x1f9   : > { %v931_v22 = vadd.f32 %v930_v21, %v836_v15  ;;  %v932_v23 = vpop.f32.mrb[2].mxu0  ;;  %v942_v21 = vld [vmem:[%s4510_s5] sm:$0xff] }
 0x1fa   : > { %vm935_vm10 = vcmp.gt.f32.partialorder %v929_v19, 0.0  ;;  %v937_v24 = vmul.f32 0.01, %v929_v19  ;;  %v933_v27 = vpop.f32.mrb[3].mxu0 }
 0x1fb   : > { %vm936_vm11 = vcmp.gt.f32.partialorder %v931_v22, 0.0  ;;  %v938_v29 = vmul.f32 0.01, %v931_v22 }
 0x1fc   : > { %v939_v30 = vsel %vm935_vm10, %v929_v19, %v937_v24 }
 0x1fd   : > { %v940_v35 = vsel %vm936_vm11, %v931_v22, %v938_v29  ;;  %v976_v41 = vmul.f32 %v939_v30, %v3866_v38  ;;  %v949_v31 = vmul.f32 %v939_v30, %v3860_v36  ;;  %v1003_v32 = vmul.f32 %v939_v30, %v3882_v47  ;;  %v1084_v22 = vpop.permute.xlu1 %1083 }
 0x1fe   : > { %v950_v43 = vmul.f32 %v940_v35, %v3854_v34  ;;  %v1067_v45 = vmul.f32 %v939_v30, %v3911_v63  ;;  %v1068_v49 = vmul.f32 %v940_v35, %v3916_v3  ;;  %v1030_v51 = vmul.f32 %v939_v30, %v3897_v55 }
 0x1ff   : > { %v3557_v46 = vpack.c.bf16 %v976_v41, %v3872_v42  ;;  %v3555_v48 = vpack.c.bf16 %v949_v31, %v3868_v39  ;;  %v977_v52 = vmul.f32 %v940_v35, %v3852_v33  ;;  %v1094_v56 = vmul.f32 %v939_v30, %v3924_v9 }
 0x200   : > { %v3564_v54 = vpack.c.bf16 %v1068_v49, %v1067_v45  ;;  %v1095_v57 = vmul.f32 %v940_v35, %v3931_v12  ;;  %v3559_v59 = vpack.c.bf16 %v1003_v32, %v3887_v50  ;;  %v3556_v60 = vpack.c.bf16 %v950_v43, %v950_v43 }
 0x201   : > { %989 = vrot.lane.b32.xlu0 %v3557_v46, %s3704_s13  ;;  %962 = vrot.lane.b32.xlu1 %v3555_v48, %s3705_s14  ;;  %v1121_v62 = vmul.f32 %v939_v30, %v3938_v17  ;;  %v1122_v0 = vmul.f32 %v940_v35, %v3946_v20  ;;  %v1148_v4 = vmul.f32 %v939_v30, %v3953_v25 }
 0x202   : > { %v3566_v1 = vpack.c.bf16 %v1095_v57, %v1094_v56  ;;  %v1149_v61 = vmul.f32 %v940_v35, %v3961_v28  ;;  %v4029_v6 = vpack.c.bf16 %v940_v35, %v939_v30  ;;  %v3561_v11 = vpack.c.bf16 %v1030_v51, %v3902_v58 }
 0x203   : > { %v3568_v7 = vpack.c.bf16 %v1122_v0, %v1121_v62  ;;  %v3558_v13 = vpack.c.bf16 %v977_v52, %v977_v52  ;;  %v1004_v14 = vmul.f32 %v940_v35, %v3875_v44  ;;  %v1031_v16 = vmul.f32 %v940_v35, %v3892_v53 }
 0x204   : > { %v3570_v8 = vpack.c.bf16 %v1149_v61, %v1148_v4 }
 0x205   : > { %1016 = vrot.lane.b32.xlu0 %v3559_v59, %s3703_s26  ;;  %964 = vrot.lane.b32.xlu1 %v3556_v60, %s3705_s14  ;;  %v3560_v15 = vpack.c.bf16 %v1004_v14, %v1004_v14  ;;  %v3562_v19 = vpack.c.bf16 %v1031_v16, %v1031_v16  ;;  %v1086_v60 = vrot.slane %v1084_v22, 4 }
 0x209   : > { %1043 = vrot.lane.b32.xlu0 %v3561_v11, %s3702_s22  ;;  %991 = vrot.lane.b32.xlu1 %v3558_v13, %s3704_s13 }
 0x20d   : > { %1081 = vrot.lane.b32.xlu0 %v3564_v54, %s3701_s19  ;;  %1018 = vrot.lane.b32.xlu1 %v3560_v15, %s3703_s26 }
 0x211   : > { %1108 = vrot.lane.b32.xlu0 %v3566_v1, %s3700_s16  ;;  %1045 = vrot.lane.b32.xlu1 %v3562_v19, %s3702_s22 }
 0x215   : > { %1135 = vrot.lane.b32.xlu0 %v3568_v7, %s3698_s28  ;;  %1110 = vrot.lane.b32.xlu1 %v3940_v18, %s3700_s16 }
 0x219   : > { %1162 = vrot.lane.b32.xlu0 %v3570_v8, %s3699_s29  ;;  %1137 = vrot.lane.b32.xlu1 %v3955_v26, %s3698_s28 }
 0x21d   : > { %1183 = vperm.xlu0 %3686, %v942_v21   ;;  %1164 = vrot.lane.b32.xlu1 %v3968_v37, %s3699_s29 }
 0x221   : > { %1429 = vrot.lane.b32.xlu0 %v3926_v10, %s3701_s19 }
 0x273   : > { %v990_v23 = vpop.permute.xlu0 %989  ;;  %v963_v24 = vpop.permute.xlu1 %962 }
 0x274   : > { %v966_v35 = vrot.slane %v963_v24, 4  ;;  %v993_v32 = vrot.slane %v990_v23, 4 }
 0x277   : > { %v1017_v27 = vpop.permute.xlu0 %1016  ;;  %v965_v29 = vpop.permute.xlu1 %964 }
 0x278   : > { %v967_v30 = vrot.slane %v965_v29, 4  ;;  %v1020_v62 = vrot.slane %v1017_v27, 4 }
 0x27a   : > { %v968_v45 = vsel %vm548_vm8, %v966_v35, %v967_v30 }
 0x27b   : > { %v1044_v41 = vpop.permute.xlu0 %1043  ;;  %v992_v31 = vpop.permute.xlu1 %991  ;;  %v969_v51 = vsel %vm550_vm7, %v963_v24, %v968_v45 }
 0x27c   : > { %v994_v43 = vrot.slane %v992_v31, 4  ;;  %v1047_v4 = vrot.slane %v1044_v41, 4 }
 0x27e   : > { %v995_v46 = vsel %vm548_vm8, %v993_v32, %v994_v43 }
 0x27f   : > { %v1082_v48 = vpop.permute.xlu0 %1081  ;;  %v1019_v49 = vpop.permute.xlu1 %1018  ;;  %v996_v52 = vsel %vm587_vm6, %v990_v23, %v995_v46 }
 0x280   : > { %v1085_v54 = vrot.slane %v1082_v48, 4  ;;  %v1021_v56 = vrot.slane %v1019_v49, 4  ;;  %v3359_v57 = vcombine.high %v969_v51, %v996_v52  ;;  %v3358_v59 = vcombine.low %v969_v51, %v996_v52 }
 0x282   : > { %1240 = vmatprep.subr.bf16.mxu1 %v3359_v57  ;;  %v1087_v61 = vsel %vm548_vm8, %v1085_v54, %v1086_v60  ;;  %v1022_v7 = vsel %vm548_vm8, %v1020_v62, %v1021_v56  ;;  %v941_v62 = vld [vmem:[%s4509_s4] sm:$0xf] }
 0x283   : > { %v1109_v0 = vpop.permute.xlu0 %1108  ;;  %1241 = vmatpush1.bf16.msra.mxu1 %v3358_v59  ;;  %v1046_v1 = vpop.permute.xlu1 %1045  ;;  %v1088_v13 = vsel %vm635_vm3, %v1082_v48, %v1087_v61  ;;  %v1023_v16 = vsel %vm624_vm5, %v1017_v27, %v1022_v7 }
 0x284   : > { %v1048_v8 = vrot.slane %v1046_v1, 4  ;;  %v3363_v24 = vcombine.high %v4029_v6, %v1088_v13  ;;  %v1112_v29 = vrot.slane %v1109_v0, 4  ;;  %v3362_v43 = vcombine.low %v4029_v6, %v1088_v13 }
 0x286   : > { %v1049_v11 = vsel %vm548_vm8, %v1047_v4, %v1048_v8 }
 0x287   : > { %v1136_v14 = vpop.permute.xlu0 %1135  ;;  %v1111_v15 = vpop.permute.xlu1 %1110  ;;  %v1050_v19 = vsel %vm661_vm4, %v1044_v41, %v1049_v11 }
 0x288   : > { %v1113_v21 = vrot.slane %v1111_v15, 4  ;;  %v3361_v22 = vcombine.high %v1023_v16, %v1050_v19  ;;  %v3360_v23 = vcombine.low %v1023_v16, %v1050_v19  ;;  %v1139_v35 = vrot.slane %v1136_v14, 4 }
 0x28a   : > { %1242 = vmatprep.subr.bf16.mxu1 %v3361_v22  ;;  %v1114_v31 = vsel %vm548_vm8, %v1112_v29, %v1113_v21 }
 0x28b   : > { %1243 = vmatpush1.bf16.msra.mxu1 %v3360_v23  ;;  %v1138_v30 = vpop.permute.xlu1 %1137  ;;  %v1163_v45 = vpop.permute.xlu0 %1162  ;;  %v1115_v46 = vsel %vm598_vm2, %v1109_v0, %v1114_v31 }
 0x28c   : > { %v1140_v32 = vrot.slane %v1138_v30, 4  ;;  %1244 = vmatprep.subr.bf16.mxu1 %v3363_v24  ;;  %v1166_v49 = vrot.slane %v1163_v45, 4 }
 0x28e   : > { %v1141_v27 = vsel %vm548_vm8, %v1139_v35, %v1140_v32 }
 0x28f   : > { %1245 = vmatpush1.bf16.msra.mxu1 %v3362_v43  ;;  %v1165_v41 = vpop.permute.xlu1 %1164  ;;  %v1142_v48 = vsel %vm561_vm1, %v1136_v14, %v1141_v27 }
 0x290   : > { %v1167_v51 = vrot.slane %v1165_v41, 4  ;;  %v3365_v52 = vcombine.high %v1115_v46, %v1142_v48  ;;  %v3364_v54 = vcombine.low %v1115_v46, %v1142_v48 }
 0x292   : > { %v1168_v56 = vsel %vm548_vm8, %v1166_v49, %v1167_v51  ;;  %1246 = vmatprep.subr.bf16.mxu1 %v3365_v52 }
 0x293   : > { %v1169_v57 = vsel %vm523_vm0, %v1163_v45, %v1168_v56  ;;  %1247 = vmatpush1.bf16.msra.mxu1 %v3364_v54 }
 0x294   : > { %v3367_v6 = vcombine.high %v1169_v57, %v1169_v57  ;;  %v3366_v59 = vcombine.low %v1169_v57, %v1169_v57 }
 0x296   : > { %3368 = vmatprep.subr.msk.bf16.mxu1 %vm548_vm8, %v3367_v6  ;;  %v1235_v60 = vsel %vm548_vm8, %v3366_v59, 0 }
 0x297   : > { %1249 = vmatpush1.bf16.msra.mxu1 %v1235_v60 }
 0x29a   : > { %3369 = vmatmul.mubr.msk.bf16.vlgmr.msra.gmra.mrb[0].mxu1 %vm883_vm9, %v941_v62 }
 0x29b   : > { %1998 = vmatprep.mubr.bf16.mxu1 %v3706_v40 }
 0x29c   : > { %v1184_v0 = vpop.permute.xlu0 %1183 }
 0x36d   : > { %v1274_v1 = vpop.f32.mrb[0].mxu1 }
 0x36e   : > { %v1275_v4 = vadd.f32 %v1274_v1, %v1184_v0  ;;  %v1276_v61 = vpop.f32.mrb[1].mxu1 }
 0x36f   : > { %v1277_v7 = vadd.f32 %v1276_v61, %v1184_v0  ;;  %v1278_v8 = vpop.f32.mrb[2].mxu1  ;;  %v1288_v61 = vld [vmem:[%s4512_s7] sm:$0xff] }
 0x370   : > { %vm1281_vm12 = vcmp.gt.f32.partialorder %v1275_v4, 0.0  ;;  %v1283_v11 = vmul.f32 0.01, %v1275_v4  ;;  %v1279_v13 = vpop.f32.mrb[3].mxu1 }
 0x371   : > { %vm1282_vm13 = vcmp.gt.f32.partialorder %v1277_v7, 0.0  ;;  %v1284_v14 = vmul.f32 0.01, %v1277_v7 }
 0x372   : > { %v1285_v15 = vsel %vm1281_vm12, %v1275_v4, %v1283_v11 }
 0x373   : > { %v1286_v16 = vsel %vm1282_vm13, %v1277_v7, %v1284_v14  ;;  %v1295_v19 = vmul.f32 %v1285_v15, %v3860_v36  ;;  %v1322_v23 = vmul.f32 %v1285_v15, %v3866_v38  ;;  %v1349_v30 = vmul.f32 %v1285_v15, %v3882_v47  ;;  %v1430_v7 = vpop.permute.xlu0 %1429 }
 0x374   : > { %v1296_v21 = vmul.f32 %v1286_v16, %v3854_v34  ;;  %v1323_v29 = vmul.f32 %v1286_v16, %v3852_v33  ;;  %v1413_v35 = vmul.f32 %v1285_v15, %v3911_v63  ;;  %v1414_v31 = vmul.f32 %v1286_v16, %v3916_v3 }
 0x375   : > { %v3572_v22 = vpack.c.bf16 %v1295_v19, %v3868_v39  ;;  %v1440_v32 = vmul.f32 %v1285_v15, %v3924_v9  ;;  %v1441_v43 = vmul.f32 %v1286_v16, %v3931_v12  ;;  %v1467_v45 = vmul.f32 %v1285_v15, %v3938_v17 }
 0x376   : > { %v3573_v24 = vpack.c.bf16 %v1296_v21, %v1296_v21  ;;  %v1468_v27 = vmul.f32 %v1286_v16, %v3946_v20  ;;  %v1494_v41 = vmul.f32 %v1285_v15, %v3953_v25  ;;  %v3574_v46 = vpack.c.bf16 %v1322_v23, %v3872_v42 }
 0x377   : > { %1308 = vrot.lane.b32.xlu1 %v3572_v22, %s3705_s14  ;;  %v3581_v48 = vpack.c.bf16 %v1414_v31, %v1413_v35  ;;  %v1495_v49 = vmul.f32 %v1286_v16, %v3961_v28  ;;  %v4097_v51 = vpack.c.bf16 %v1286_v16, %v1285_v15  ;;  %v3575_v52 = vpack.c.bf16 %v1323_v29, %v1323_v29 }
 0x378   : > { %1310 = vrot.lane.b32.xlu0 %v3573_v24, %s3705_s14  ;;  %v1350_v54 = vmul.f32 %v1286_v16, %v3875_v44  ;;  %v3583_v56 = vpack.c.bf16 %v1441_v43, %v1440_v32  ;;  %v3585_v57 = vpack.c.bf16 %v1468_v27, %v1467_v45  ;;  %v3576_v59 = vpack.c.bf16 %v1349_v30, %v3887_v50 }
 0x379   : > { %v3587_v6 = vpack.c.bf16 %v1495_v49, %v1494_v41  ;;  %v1376_v60 = vmul.f32 %v1285_v15, %v3897_v55  ;;  %v1377_v0 = vmul.f32 %v1286_v16, %v3892_v53 }
 0x37a   : > { %v3577_v62 = vpack.c.bf16 %v1350_v54, %v1350_v54 }
 0x37b   : > { %1335 = vrot.lane.b32.xlu1 %v3574_v46, %s3704_s13  ;;  %v3578_v1 = vpack.c.bf16 %v1376_v60, %v3902_v58  ;;  %v3579_v4 = vpack.c.bf16 %v1377_v0, %v1377_v0 }
 0x37c   : > { %1337 = vrot.lane.b32.xlu0 %v3575_v52, %s3704_s13 }
 0x37f   : > { %1362 = vrot.lane.b32.xlu1 %v3576_v59, %s3703_s26 }
 0x380   : > { %1364 = vrot.lane.b32.xlu0 %v3577_v62, %s3703_s26 }
 0x383   : > { %1389 = vrot.lane.b32.xlu1 %v3578_v1, %s3702_s22 }
 0x384   : > { %1391 = vrot.lane.b32.xlu0 %v3579_v4, %s3702_s22 }
 0x387   : > { %1427 = vrot.lane.b32.xlu1 %v3581_v48, %s3701_s19 }
 0x388   : > { %1456 = vrot.lane.b32.xlu0 %v3940_v18, %s3700_s16 }
 0x38b   : > { %1454 = vrot.lane.b32.xlu1 %v3583_v56, %s3700_s16  ;;  %v1432_v56 = vrot.slane %v1430_v7, 4 }
 0x38c   : > { %1483 = vrot.lane.b32.xlu0 %v3955_v26, %s3698_s28 }
 0x38f   : > { %1481 = vrot.lane.b32.xlu1 %v3585_v57, %s3698_s28 }
 0x390   : > { %1510 = vrot.lane.b32.xlu0 %v3968_v37, %s3699_s29 }
 0x393   : > { %1508 = vrot.lane.b32.xlu1 %v3587_v6, %s3699_s29 }
 0x397   : > { %1529 = vperm.xlu1 %3687, %v1288_v61  }
 0x39b   : > { %1781 = vrot.lane.b32.xlu1 %v3926_v10, %s3701_s19 }
 0x3e9   : > { %v1309_v8 = vpop.permute.xlu1 %1308 }
 0x3ea   : > { %v1311_v11 = vpop.permute.xlu0 %1310  ;;  %v1312_v13 = vrot.slane %v1309_v8, 4 }
 0x3eb   : > { %v1313_v14 = vrot.slane %v1311_v11, 4 }
 0x3ed   : > { %v1336_v15 = vpop.permute.xlu1 %1335  ;;  %v1314_v21 = vsel %vm548_vm8, %v1312_v13, %v1313_v14 }
 0x3ee   : > { %v1339_v16 = vrot.slane %v1336_v15, 4  ;;  %v1338_v19 = vpop.permute.xlu0 %1337  ;;  %v1315_v30 = vsel %vm550_vm7, %v1309_v8, %v1314_v21 }
 0x3ef   : > { %v1340_v22 = vrot.slane %v1338_v19, 4 }
 0x3f1   : > { %v1341_v23 = vsel %vm548_vm8, %v1339_v16, %v1340_v22  ;;  %v1363_v24 = vpop.permute.xlu1 %1362 }
 0x3f2   : > { %v1365_v29 = vpop.permute.xlu0 %1364  ;;  %v1342_v35 = vsel %vm587_vm6, %v1336_v15, %v1341_v23  ;;  %v1366_v31 = vrot.slane %v1363_v24, 4 }
 0x3f3   : > { %v1367_v32 = vrot.slane %v1365_v29, 4  ;;  %v3387_v43 = vcombine.low %v1315_v30, %v1342_v35  ;;  %v3388_v45 = vcombine.high %v1315_v30, %v1342_v35 }
 0x3f5   : > { %1586 = vmatprep.subr.bf16.mxu0 %v3388_v45  ;;  %v1390_v27 = vpop.permute.xlu1 %1389  ;;  %v1368_v48 = vsel %vm548_vm8, %v1366_v31, %v1367_v32 }
 0x3f6   : > { %v1393_v41 = vrot.slane %v1390_v27, 4  ;;  %v1392_v46 = vpop.permute.xlu0 %1391  ;;  %1587 = vmatpush1.bf16.msra.mxu0 %v3387_v43  ;;  %v1369_v59 = vsel %vm624_vm5, %v1363_v24, %v1368_v48  ;;  %v1287_v48 = vld [vmem:[%s4511_s6] sm:$0xf] }
 0x3f7   : > { %v1394_v49 = vrot.slane %v1392_v46, 4 }
 0x3f9   : > { %v1395_v52 = vsel %vm548_vm8, %v1393_v41, %v1394_v49  ;;  %v1428_v54 = vpop.permute.xlu1 %1427 }
 0x3fa   : > { %v1431_v57 = vrot.slane %v1428_v54, 4  ;;  %v1457_v6 = vpop.permute.xlu0 %1456  ;;  %v1396_v60 = vsel %vm661_vm4, %v1390_v27, %v1395_v52 }
 0x3fb   : > { %v3389_v62 = vcombine.low %v1369_v59, %v1396_v60  ;;  %v3390_v0 = vcombine.high %v1369_v59, %v1396_v60  ;;  %v1459_v14 = vrot.slane %v1457_v6, 4 }
 0x3fc   : > { %v1433_v1 = vsel %vm548_vm8, %v1431_v57, %v1432_v56 }
 0x3fd   : > { %v1434_v4 = vsel %vm635_vm3, %v1428_v54, %v1433_v1  ;;  %1588 = vmatprep.subr.bf16.mxu0 %v3390_v0  ;;  %v1455_v61 = vpop.permute.xlu1 %1454 }
 0x3fe   : > { %v3392_v8 = vcombine.high %v4097_v51, %v1434_v4  ;;  %v1458_v11 = vrot.slane %v1455_v61, 4  ;;  %v1484_v13 = vpop.permute.xlu0 %1483  ;;  %1589 = vmatpush1.bf16.msra.mxu0 %v3389_v62  ;;  %v3391_v7 = vcombine.low %v4097_v51, %v1434_v4 }
 0x3ff   : > { %v1486_v19 = vrot.slane %v1484_v13, 4 }
 0x400   : > { %1590 = vmatprep.subr.bf16.mxu0 %v3392_v8  ;;  %v1460_v16 = vsel %vm548_vm8, %v1458_v11, %v1459_v14 }
 0x401   : > { %v1482_v15 = vpop.permute.xlu1 %1481  ;;  %v1461_v24 = vsel %vm598_vm2, %v1455_v61, %v1460_v16 }
 0x402   : > { %v1485_v21 = vrot.slane %v1482_v15, 4  ;;  %1591 = vmatpush1.bf16.msra.mxu0 %v3391_v7  ;;  %v1511_v22 = vpop.permute.xlu0 %1510 }
 0x403   : > { %v1513_v32 = vrot.slane %v1511_v22, 4 }
 0x404   : > { %v1487_v23 = vsel %vm548_vm8, %v1485_v21, %v1486_v19 }
 0x405   : > { %v1488_v29 = vsel %vm561_vm1, %v1482_v15, %v1487_v23  ;;  %v1509_v30 = vpop.permute.xlu1 %1508 }
 0x406   : > { %v3393_v35 = vcombine.low %v1461_v24, %v1488_v29  ;;  %v3394_v31 = vcombine.high %v1461_v24, %v1488_v29  ;;  %v1512_v51 = vrot.slane %v1509_v30, 4 }
 0x408   : > { %v1514_v43 = vsel %vm548_vm8, %v1512_v51, %v1513_v32  ;;  %1592 = vmatprep.subr.bf16.mxu0 %v3394_v31 }
 0x409   : > { %v1515_v45 = vsel %vm523_vm0, %v1509_v30, %v1514_v43  ;;  %1593 = vmatpush1.bf16.msra.mxu0 %v3393_v35 }
 0x40a   : > { %v3395_v27 = vcombine.low %v1515_v45, %v1515_v45  ;;  %v3396_v41 = vcombine.high %v1515_v45, %v1515_v45 }
 0x40c   : > { %3397 = vmatprep.subr.msk.bf16.mxu0 %vm548_vm8, %v3396_v41  ;;  %v1581_v46 = vsel %vm548_vm8, %v3395_v27, 0 }
 0x40d   : > { %1595 = vmatpush1.bf16.msra.mxu0 %v1581_v46 }
 0x410   : > { %3398 = vmatmul.mubr.msk.bf16.vlgmr.msra.gmra.mrb[4].mxu0 %vm883_vm9, %v1287_v48 }
 0x411   : > { %3053 = vmatprep.mubr.bf16.mxu0 %v3706_v40 }
 0x416   : > { %v1530_v49 = vpop.permute.xlu1 %1529 }
 0x4e3   : > { %v1620_v52 = vpop.f32.mrb[4].mxu0 }
 0x4e4   : > { %v1621_v54 = vadd.f32 %v1620_v52, %v1530_v49  ;;  %v1622_v56 = vpop.f32.mrb[5].mxu0 }
 0x4e5   : > { %v1623_v57 = vadd.f32 %v1622_v56, %v1530_v49  ;;  %v1624_v6 = vpop.f32.mrb[6].mxu0  ;;  %v1640_v56 = vld [vmem:[%s4514_s9 + $0x18] sm:$0xff] }
 0x4e6   : > { %vm1627_vm14 = vcmp.gt.f32.partialorder %v1621_v54, 0.0  ;;  %v1629_v59 = vmul.f32 0.01, %v1621_v54  ;;  %v1625_v60 = vpop.f32.mrb[7].mxu0  ;;  %v1637_v6 = vld [vmem:[%s4514_s9] sm:$0xff] }
 0x4e7   : > { %vm1628_vm15 = vcmp.gt.f32.partialorder %v1623_v57, 0.0  ;;  %v1630_v62 = vmul.f32 0.01, %v1623_v57  ;;  %v1782_v60 = vpop.permute.xlu1 %1781 }
 0x4e8   : > { %v1631_v0 = vsel %vm1627_vm14, %v1621_v54, %v1629_v59  ;;  %v1638_v59 = vld [vmem:[%s4514_s9 + $0x8] sm:$0xff] }
 0x4e9   : > { %v1632_v1 = vsel %vm1628_vm15, %v1623_v57, %v1630_v62  ;;  %v1647_v4 = vmul.f32 %v1631_v0, %v3860_v36  ;;  %v1674_v11 = vmul.f32 %v1631_v0, %v3866_v38  ;;  %v1701_v14 = vmul.f32 %v1631_v0, %v3882_v47  ;;  %v1639_v57 = vld [vmem:[%s4514_s9 + $0x10] sm:$0xff] }
 0x4ea   : > { %v1648_v61 = vmul.f32 %v1632_v1, %v3854_v34  ;;  %v1675_v7 = vmul.f32 %v1632_v1, %v3852_v33  ;;  %v1765_v15 = vmul.f32 %v1631_v0, %v3911_v63  ;;  %v1766_v16 = vmul.f32 %v1632_v1, %v3916_v3 }
 0x4eb   : > { %v3589_v8 = vpack.c.bf16 %v1647_v4, %v3868_v39  ;;  %v1792_v19 = vmul.f32 %v1631_v0, %v3924_v9  ;;  %v1793_v21 = vmul.f32 %v1632_v1, %v3931_v12  ;;  %v1819_v22 = vmul.f32 %v1631_v0, %v3938_v17 }
 0x4ec   : > { %v3590_v13 = vpack.c.bf16 %v1648_v61, %v1648_v61  ;;  %v1820_v23 = vmul.f32 %v1632_v1, %v3946_v20  ;;  %v1846_v24 = vmul.f32 %v1631_v0, %v3953_v25  ;;  %v3591_v29 = vpack.c.bf16 %v1674_v11, %v3872_v42 }
 0x4ed   : > { %1660 = vrot.lane.b32.xlu0 %v3589_v8, %s3705_s14  ;;  %v3598_v30 = vpack.c.bf16 %v1766_v16, %v1765_v15  ;;  %v1847_v35 = vmul.f32 %v1632_v1, %v3961_v28  ;;  %v4167_v31 = vpack.c.bf16 %v1632_v1, %v1631_v0  ;;  %v3592_v32 = vpack.c.bf16 %v1675_v7, %v1675_v7 }
 0x4ee   : > { %1662 = vrot.lane.b32.xlu1 %v3590_v13, %s3705_s14  ;;  %v1702_v51 = vmul.f32 %v1632_v1, %v3875_v44  ;;  %v3600_v43 = vpack.c.bf16 %v1793_v21, %v1792_v19  ;;  %v3602_v45 = vpack.c.bf16 %v1820_v23, %v1819_v22  ;;  %v3593_v41 = vpack.c.bf16 %v1701_v14, %v3887_v50 }
 0x4ef   : > { %v3604_v27 = vpack.c.bf16 %v1847_v35, %v1846_v24  ;;  %v1728_v46 = vmul.f32 %v1631_v0, %v3897_v55  ;;  %v1729_v49 = vmul.f32 %v1632_v1, %v3892_v53 }
 0x4f0   : > { %v3594_v48 = vpack.c.bf16 %v1702_v51, %v1702_v51 }
 0x4f1   : > { %1687 = vrot.lane.b32.xlu0 %v3591_v29, %s3704_s13  ;;  %v3595_v52 = vpack.c.bf16 %v1728_v46, %v3902_v58  ;;  %v3596_v54 = vpack.c.bf16 %v1729_v49, %v1729_v49 }
 0x4f2   : > { %1689 = vrot.lane.b32.xlu1 %v3592_v32, %s3704_s13 }
 0x4f5   : > { %1714 = vrot.lane.b32.xlu0 %v3593_v41, %s3703_s26 }
 0x4f6   : > { %1716 = vrot.lane.b32.xlu1 %v3594_v48, %s3703_s26 }
 0x4f9   : > { %1741 = vrot.lane.b32.xlu0 %v3595_v52, %s3702_s22 }
 0x4fa   : > { %1743 = vrot.lane.b32.xlu1 %v3596_v54, %s3702_s22 }
 0x4fd   : > { %1779 = vrot.lane.b32.xlu0 %v3598_v30, %s3701_s19 }
 0x4fe   : > { %1808 = vrot.lane.b32.xlu1 %v3940_v18, %s3700_s16 }
 0x501   : > { %1806 = vrot.lane.b32.xlu0 %v3600_v43, %s3700_s16 }
 0x502   : > { %1835 = vrot.lane.b32.xlu1 %v3955_v26, %s3698_s28 }
 0x505   : > { %1833 = vrot.lane.b32.xlu0 %v3602_v45, %s3698_s28 }
 0x506   : > { %1862 = vrot.lane.b32.xlu1 %v3968_v37, %s3699_s29 }
 0x509   : > { %1860 = vrot.lane.b32.xlu0 %v3604_v27, %s3699_s29  ;;  %v1784_v27 = vrot.slane %v1782_v60, 4 }
 0x50a   : > { %1896 = vperm.xlu1 %3687, %v1640_v56  }
 0x50d   : > { %1891 = vperm.xlu0 %3686, %v1639_v57  }
 0x50e   : > { %1881 = vperm.xlu1 %3687, %v1637_v6  }
 0x511   : > { %1886 = vperm.xlu0 %3686, %v1638_v59  }
 0x512   : > { %2354 = vrot.lane.b32.xlu1 %v3926_v10, %s3701_s19 }
 0x516   : > { %2403 = vrot.lane.b32.xlu1 %v3926_v10, %s3701_s19 }
 0x51a   : > { %2631 = vrot.lane.b32.xlu1 %v3926_v10, %s3701_s19 }
 0x51e   : > { %2680 = vrot.lane.b32.xlu1 %v3926_v10, %s3701_s19 }
 0x55f   : > { %v1661_v62 = vpop.permute.xlu0 %1660 }
 0x560   : > { %v1663_v0 = vpop.permute.xlu1 %1662  ;;  %v1664_v1 = vrot.slane %v1661_v62, 4 }
 0x561   : > { %v1665_v4 = vrot.slane %v1663_v0, 4 }
 0x563   : > { %v1688_v61 = vpop.permute.xlu0 %1687  ;;  %v1666_v13 = vsel %vm548_vm8, %v1664_v1, %v1665_v4 }
 0x564   : > { %v1691_v8 = vrot.slane %v1688_v61, 4  ;;  %v1690_v11 = vpop.permute.xlu1 %1689  ;;  %v1667_v19 = vsel %vm550_vm7, %v1661_v62, %v1666_v13 }
 0x565   : > { %v1692_v7 = vrot.slane %v1690_v11, 4 }
 0x567   : > { %v1693_v14 = vsel %vm548_vm8, %v1691_v8, %v1692_v7  ;;  %v1715_v15 = vpop.permute.xlu0 %1714 }
 0x568   : > { %v1717_v16 = vpop.permute.xlu1 %1716  ;;  %v1694_v21 = vsel %vm587_vm6, %v1688_v61, %v1693_v14  ;;  %v1718_v10 = vrot.slane %v1715_v15, 4 }
 0x569   : > { %v1719_v22 = vrot.slane %v1717_v16, 4  ;;  %v3418_v23 = vcombine.low %v1667_v19, %v1694_v21  ;;  %v3419_v24 = vcombine.high %v1667_v19, %v1694_v21 }
 0x56b   : > { %v1742_v29 = vpop.permute.xlu0 %1741  ;;  %1966 = vmatprep.subr.bf16.mxu1 %v3419_v24  ;;  %v1720_v32 = vsel %vm548_vm8, %v1718_v10, %v1719_v22 }
 0x56c   : > { %v1745_v30 = vrot.slane %v1742_v29, 4  ;;  %1967 = vmatpush1.bf16.msra.mxu1 %v3418_v23  ;;  %v1744_v35 = vpop.permute.xlu1 %1743  ;;  %v1721_v48 = vsel %vm624_vm5, %v1715_v15, %v1720_v32  ;;  %v3689_v32 = vld [vmem:[%s4513_s8 + $0x8] sm:$0xff]  }
 0x56d   : > { %v1746_v51 = vrot.slane %v1744_v35, 4  ;;  %v3688_v35 = vld [vmem:[%s4513_s8] sm:$0xff]  }
 0x56f   : > { %v1747_v43 = vsel %vm548_vm8, %v1745_v30, %v1746_v51  ;;  %v1780_v45 = vpop.permute.xlu0 %1779 }
 0x570   : > { %v1783_v41 = vrot.slane %v1780_v45, 4  ;;  %v1809_v46 = vpop.permute.xlu1 %1808  ;;  %v1748_v49 = vsel %vm661_vm4, %v1742_v29, %v1747_v43 }
 0x571   : > { %v3420_v52 = vcombine.low %v1721_v48, %v1748_v49  ;;  %v3421_v54 = vcombine.high %v1721_v48, %v1748_v49  ;;  %v1811_v1 = vrot.slane %v1809_v46, 4 }
 0x572   : > { %v1785_v56 = vsel %vm548_vm8, %v1783_v41, %v1784_v27 }
 0x573   : > { %v1786_v57 = vsel %vm635_vm3, %v1780_v45, %v1785_v56  ;;  %v1807_v6 = vpop.permute.xlu0 %1806  ;;  %1968 = vmatprep.subr.bf16.mxu1 %v3421_v54 }
 0x574   : > { %v3423_v59 = vcombine.high %v4167_v31, %v1786_v57  ;;  %v1810_v62 = vrot.slane %v1807_v6, 4  ;;  %1969 = vmatpush1.bf16.msra.mxu1 %v3420_v52  ;;  %v1836_v0 = vpop.permute.xlu1 %1835  ;;  %v3422_v60 = vcombine.low %v4167_v31, %v1786_v57 }
 0x575   : > { %v1838_v8 = vrot.slane %v1836_v0, 4 }
 0x576   : > { %1970 = vmatprep.subr.bf16.mxu1 %v3423_v59  ;;  %v1812_v61 = vsel %vm548_vm8, %v1810_v62, %v1811_v1 }
 0x577   : > { %v1834_v4 = vpop.permute.xlu0 %1833  ;;  %v1813_v14 = vsel %vm598_vm2, %v1807_v6, %v1812_v61 }
 0x578   : > { %v1837_v11 = vrot.slane %v1834_v4, 4  ;;  %1971 = vmatpush1.bf16.msra.mxu1 %v3422_v60  ;;  %v1863_v13 = vpop.permute.xlu1 %1862 }
 0x579   : > { %v1865_v10 = vrot.slane %v1863_v13, 4 }
 0x57a   : > { %v1839_v7 = vsel %vm548_vm8, %v1837_v11, %v1838_v8 }
 0x57b   : > { %v1840_v15 = vsel %vm561_vm1, %v1834_v4, %v1839_v7  ;;  %v1861_v16 = vpop.permute.xlu0 %1860 }
 0x57c   : > { %v3424_v19 = vcombine.low %v1813_v14, %v1840_v15  ;;  %v3425_v21 = vcombine.high %v1813_v14, %v1840_v15  ;;  %v1864_v31 = vrot.slane %v1861_v16, 4 }
 0x57e   : > { %v1866_v22 = vsel %vm548_vm8, %v1864_v31, %v1865_v10  ;;  %1972 = vmatprep.subr.bf16.mxu1 %v3425_v21 }
 0x57f   : > { %v1867_v23 = vsel %vm523_vm0, %v1861_v16, %v1866_v22  ;;  %1973 = vmatpush1.bf16.msra.mxu1 %v3424_v19 }
 0x580   : > { %v3426_v24 = vcombine.low %v1867_v23, %v1867_v23  ;;  %v3427_v29 = vcombine.high %v1867_v23, %v1867_v23 }
 0x582   : > { %3428 = vmatprep.subr.msk.bf16.mxu1 %vm548_vm8, %v3427_v29  ;;  %v1961_v30 = vsel %vm548_vm8, %v3426_v24, 0 }
 0x583   : > { %1975 = vmatpush1.bf16.msra.mxu1 %v1961_v30 }
 0x586   : > { %3429 = vmatmul.mubr.msk.bf16.vlgmr.msra.gmra.mrb[4].mxu1 %vm883_vm9, %v3688_v35 }
 0x587   : > { %2008 = vmatprep.mubr.bf16.mxu1 %v3706_v40 }
 0x589   : > { %v1897_v51 = vpop.permute.xlu1 %1896 }
 0x58c   : > { %v1892_v43 = vpop.permute.xlu0 %1891 }
 0x58d   : > { %v1882_v45 = vpop.permute.xlu1 %1881 }
 0x58e   : > { %3430 = vmatmul.mubr.msk.bf16.gmra.mrb[8].mxu1 %vm883_vm9, %v3689_v32 }
 0x58f   : > { %3094 = vmatprep.mubr.bf16.mxu1 %v3706_v40 }
 0x590   : > { %v1887_v48 = vpop.permute.xlu0 %1886 }
 0x659   : > { %v2000_v27 = vpop.f32.mrb[4].mxu1 }
 0x65a   : > { %v2001_v41 = vadd.f32 %v2000_v27, %v1882_v45  ;;  %v2002_v46 = vpop.f32.mrb[5].mxu1 }
 0x65b   : > { %v2003_v49 = vadd.f32 %v2002_v46, %v1882_v45  ;;  %v2004_v52 = vpop.f32.mrb[6].mxu1 }
 0x65c   : > { %vm2019_vm10 = vcmp.gt.f32.partialorder %v2001_v41, 0.0  ;;  %v2027_v54 = vmul.f32 0.01, %v2001_v41  ;;  %v2005_v56 = vadd.f32 %v2004_v52, %v1887_v48  ;;  %v2006_v57 = vpop.f32.mrb[7].mxu1 }
 0x65d   : > { %vm2020_vm11 = vcmp.gt.f32.partialorder %v2003_v49, 0.0  ;;  %v2028_v6 = vmul.f32 0.01, %v2003_v49  ;;  %v2007_v59 = vadd.f32 %v2006_v57, %v1887_v48 }
 0x65e   : > { %v4240_v62 = vsel %vm2019_vm10, %v2001_v41, %v2027_v54  ;;  %vm2021_vm12 = vcmp.gt.f32.partialorder %v2005_v56, 0.0  ;;  %v2029_v0 = vmul.f32 0.01, %v2005_v56 }
 0x65f   : > { %v2036_v60 = vsel %vm2020_vm11, %v2003_v49, %v2028_v6  ;;  %vm2022_vm13 = vcmp.gt.f32.partialorder %v2007_v59, 0.0  ;;  %v2030_v1 = vmul.f32 0.01, %v2007_v59  ;;  %v2338_v4 = vmul.f32 %v4240_v62, %v3911_v63 }
 0x660   : > { %v2037_v61 = vsel %vm2021_vm12, %v2005_v56, %v2029_v0  ;;  %v2339_v8 = vmul.f32 %v2036_v60, %v3916_v3  ;;  %v2539_v11 = vmul.f32 %v4240_v62, %v3938_v17  ;;  %v2540_v13 = vmul.f32 %v2036_v60, %v3946_v20 }
 0x661   : > { %v2038_v7 = vsel %vm2022_vm13, %v2007_v59, %v2030_v1  ;;  %v2010_v14 = vpop.f32.mrb[8].mxu1  ;;  %v4249_v15 = vmul.f32 %v2037_v61, %v3924_v9  ;;  %v2566_v16 = vmul.f32 %v2037_v61, %v3938_v17  ;;  %v2745_v1 = vmul.f32 %v4240_v62, %v3953_v25 }
 0x662   : > { %v2011_v19 = vadd.f32 %v2010_v14, %v1892_v43  ;;  %v2012_v21 = vpop.f32.mrb[9].mxu1  ;;  %v3628_v10 = vpack.c.bf16 %v2339_v8, %v2338_v4  ;;  %v2139_v31 = vmul.f32 %v2038_v7, %v3892_v53  ;;  %v4254_v22 = vmul.f32 %v2038_v7, %v3931_v12 }
 0x663   : > { %v2013_v23 = vadd.f32 %v2012_v21, %v1892_v43  ;;  %v2014_v24 = vpop.f32.mrb[10].mxu1  ;;  %v4256_v29 = vpack.c.bf16 %v2540_v13, %v2539_v11  ;;  %v2567_v30 = vmul.f32 %v2038_v7, %v3946_v20  ;;  %v2138_v43 = vmul.f32 %v2037_v61, %v3897_v55 }
 0x664   : > { %vm2023_vm14 = vcmp.gt.f32.partialorder %v2011_v19, 0.0  ;;  %v2031_v35 = vmul.f32 0.01, %v2011_v19  ;;  %v2015_v9 = vadd.f32 %v2014_v24, %v1897_v51  ;;  %v2016_v32 = vpop.f32.mrb[11].mxu1  ;;  %2352 = vrot.lane.b32.xlu0 %v3628_v10, %s3701_s19  ;;  %v3613_v17 = vpack.c.bf16 %v2139_v31, %v2139_v31 }
 0x665   : > { %vm2024_vm15 = vcmp.gt.f32.partialorder %v2013_v23, 0.0  ;;  %v2032_v45 = vmul.f32 0.01, %v2013_v23  ;;  %v2017_v27 = vadd.f32 %v2016_v32, %v1897_v51  ;;  %v3642_v12 = vpack.c.bf16 %v4254_v22, %v4249_v15 }
 0x666   : > { %v2039_v41 = vsel %vm2023_vm14, %v2011_v19, %v2031_v35  ;;  %2153 = vrot.lane.b32.xlu1 %v3613_v17, %s3702_s22  ;;  %v4264_v46 = vpack.c.bf16 %v2567_v30, %v2566_v16  ;;  %v2033_v48 = vmul.f32 0.01, %v2015_v9  ;;  %vm2025_vm10 = vcmp.gt.f32.partialorder %v2015_v9, 0.0 }
 0x667   : > { %v2040_v20 = vsel %vm2024_vm15, %v2013_v23, %v2032_v45  ;;  %v2034_v49 = vmul.f32 0.01, %v2017_v27  ;;  %vm2026_vm11 = vcmp.gt.f32.partialorder %v2017_v27, 0.0  ;;  %v2387_v51 = vmul.f32 %v2039_v41, %v3911_v63 }
 0x668   : > { %2629 = vrot.lane.b32.xlu0 %v3628_v10, %s3701_s19  ;;  %v2085_v52 = vmul.f32 %v2040_v20, %v3852_v33  ;;  %v2388_v54 = vmul.f32 %v2040_v20, %v3916_v3  ;;  %v3612_v56 = vpack.c.bf16 %v2138_v43, %v3902_v58  ;;  %v4272_v6 = vsel %vm2025_vm10, %v2015_v9, %v2033_v48 }
 0x669   : > { %v4274_v59 = vsel %vm2026_vm11, %v2017_v27, %v2034_v49  ;;  %v2746_v4 = vmul.f32 %v2036_v60, %v3961_v28  ;;  %v2084_v63 = vmul.f32 %v2039_v41, %v3866_v38  ;;  %v4282_v3 = vpack.c.bf16 %v2038_v7, %v2037_v61 }
 0x66a   : > { %2430 = vrot.lane.b32.xlu1 %v3613_v17, %s3702_s22  ;;  %v3632_v57 = vpack.c.bf16 %v2388_v54, %v2387_v51  ;;  %v3609_v0 = vpack.c.bf16 %v2085_v52, %v2085_v52  ;;  %v4284_v8 = vpack.c.bf16 %v2040_v20, %v2039_v41  ;;  %v4287_v13 = vpack.c.bf16 %v2036_v60, %v4240_v62 }
 0x66b   : > { %v3660_v11 = vpack.c.bf16 %v2746_v4, %v2745_v1  ;;  %v4291_v14 = vpack.c.bf16 %v4274_v59, %v4272_v6  ;;  %v4293_v16 = vpack.c.bf16 %v2038_v7, %v2036_v60  ;;  %v2291_v25 = vmul.f32 %v2040_v20, %v3875_v44 }
 0x66c   : > { %2151 = vrot.lane.b32.xlu0 %v3612_v56, %s3702_s22  ;;  %v4298_v28 = vpack.c.bf16 %v2037_v61, %v4240_v62  ;;  %v4301_v19 = vpack.c.bf16 %v4274_v59, %v2040_v20  ;;  %v4304_v21 = vpack.c.bf16 %v4272_v6, %v2039_v41  ;;  %v3608_v10 = vpack.c.bf16 %v2084_v63, %v3872_v42 }
 0x66d   : > { %v3625_v60 = vpack.c.bf16 %v2291_v25, %v2291_v25  ;;  %v2058_v7 = vmul.f32 %v4274_v59, %v3854_v34  ;;  %v2290_v44 = vmul.f32 %v2039_v41, %v3882_v47  ;;  %v2112_v61 = vmul.f32 %v4274_v59, %v3852_v33 }
 0x66e   : > { %2099 = vrot.lane.b32.xlu1 %v3609_v0, %s3704_s13  ;;  %v2057_v34 = vmul.f32 %v4272_v6, %v3860_v36  ;;  %v2188_v33 = vmul.f32 %v4274_v59, %v3892_v53  ;;  %v2355_v53 = vpop.permute.xlu1 %2354 }
 0x66f   : > { %v3607_v62 = vpack.c.bf16 %v2058_v7, %v2058_v7  ;;  %v3624_v31 = vpack.c.bf16 %v2290_v44, %v3887_v50  ;;  %v3611_v23 = vpack.c.bf16 %v2112_v61, %v2112_v61  ;;  %v2111_v50 = vmul.f32 %v4272_v6, %v3866_v38 }
 0x670   : > { %2428 = vrot.lane.b32.xlu0 %v3612_v56, %s3702_s22  ;;  %v3606_v47 = vpack.c.bf16 %v2057_v34, %v3868_v39  ;;  %v3617_v24 = vpack.c.bf16 %v2188_v33, %v2188_v33  ;;  %v2187_v38 = vmul.f32 %v4272_v6, %v3897_v55  ;;  %v2357_v25 = vrot.slane %v2355_v53, 4 }
 0x671   : > { %v3610_v36 = vpack.c.bf16 %v2111_v50, %v3872_v42  ;;  %v2044_v42 = vld [vmem:[#allocation4] sm:$0x1] }
 0x672   : > { %2251 = vrot.lane.b32.xlu1 %v3609_v0, %s3704_s13  ;;  %v3616_v39 = vpack.c.bf16 %v2187_v38, %v3902_v58  ;;  %v4366_v55 = vpop.permute.xlu1 %2403 }
 0x674   : > { %2097 = vrot.lane.b32.xlu0 %v3608_v10, %s3704_s13 }
 0x676   : > { %2305 = vrot.lane.b32.xlu1 %v3625_v60, %s3703_s26  ;;  %v4368_v58 = vpop.permute.xlu1 %2631 }
 0x678   : > { %2249 = vrot.lane.b32.xlu0 %v3608_v10, %s3704_s13 }
 0x67a   : > { %2072 = vrot.lane.b32.xlu1 %v3607_v62, %s3705_s14 }
 0x67c   : > { %2303 = vrot.lane.b32.xlu0 %v3624_v31, %s3703_s26 }
 0x67e   : > { %2278 = vrot.lane.b32.xlu1 %v3611_v23, %s3704_s13 }
 0x680   : > { %2401 = vrot.lane.b32.xlu0 %v3632_v57, %s3701_s19 }
 0x682   : > { %2126 = vrot.lane.b32.xlu1 %v3611_v23, %s3704_s13 }
 0x684   : > { %2678 = vrot.lane.b32.xlu0 %v3632_v57, %s3701_s19 }
 0x686   : > { %2528 = vrot.lane.b32.xlu1 %v3940_v18, %s3700_s16  ;;  %v4370_v18 = vpop.permute.xlu1 %2680 }
 0x688   : > { %2070 = vrot.lane.b32.xlu0 %v3606_v47, %s3705_s14 }
 0x68a   : > { %2202 = vrot.lane.b32.xlu1 %v3617_v24, %s3702_s22 }
 0x68c   : > { %2276 = vrot.lane.b32.xlu0 %v3610_v36, %s3704_s13 }
 0x68e   : > { %2555 = vrot.lane.b32.xlu1 %v3955_v26, %s3698_s28 }
 0x690   : > { %2124 = vrot.lane.b32.xlu0 %v3610_v36, %s3704_s13 }
 0x692   : > { %2707 = vrot.lane.b32.xlu1 %v3955_v26, %s3698_s28 }
 0x694   : > { %2526 = vrot.lane.b32.xlu0 %v3642_v12, %s3700_s16  ;;  %s3304_s16 = sshll.u32 %s4519_s24, 3 }
 0x695   : > { %s413_s26 = scalar_lea.vmem %s4517_s12, %s3304_s16 }
 0x696   : > { %2479 = vrot.lane.b32.xlu1 %v3617_v24, %s3702_s22 }
 0x698   : > { %2200 = vrot.lane.b32.xlu0 %v3616_v39, %s3702_s22 }
 0x69a   : > { %2734 = vrot.lane.b32.xlu1 %v3955_v26, %s3698_s28 }
 0x69c   : > { %2477 = vrot.lane.b32.xlu0 %v3616_v39, %s3702_s22 }
 0x69e   : > { %2582 = vrot.lane.b32.xlu1 %v3955_v26, %s3698_s28 }
 0x6a0   : > { %2553 = vrot.lane.b32.xlu0 %v4256_v29, %s3698_s28 }
 0x6a2   : > { %2761 = vrot.lane.b32.xlu1 %v3968_v37, %s3699_s29 }
 0x6a4   : > { %2705 = vrot.lane.b32.xlu0 %v4256_v29, %s3698_s28 }
 0x6a8   : > { %2732 = vrot.lane.b32.xlu0 %v4264_v46, %s3698_s28 }
 0x6ac   : > { %2580 = vrot.lane.b32.xlu0 %v4264_v46, %s3698_s28 }
 0x6b0   : > { %2759 = vrot.lane.b32.xlu0 %v3660_v11, %s3699_s29 }
 0x6b4   : > { %2807 = vperm.xlu0 %3686, %v2044_v42  }
 0x6d6   : > { %v2353_v26 = vpop.permute.xlu0 %2352 }
 0x6d7   : > { %v2356_v10 = vrot.slane %v2353_v26, 4 }
 0x6d8   : > { %v2154_v37 = vpop.permute.xlu1 %2153 }
 0x6d9   : > { %v2156_v24 = vrot.slane %v2154_v37, 4  ;;  %v2358_v36 = vsel %vm548_vm8, %v2356_v10, %v2357_v25 }
 0x6da   : > { %v4372_v15 = vpop.permute.xlu0 %2629 }
 0x6dc   : > { %v4374_v22 = vpop.permute.xlu1 %2430 }
 0x6de   : > { %v2152_v29 = vpop.permute.xlu0 %2151 }
 0x6df   : > { %v2155_v60 = vrot.slane %v2152_v29, 4 }
 0x6e0   : > { %v2100_v30 = vpop.permute.xlu1 %2099 }
 0x6e1   : > { %v2102_v52 = vrot.slane %v2100_v30, 4  ;;  %v2157_v39 = vsel %vm548_vm8, %v2155_v60, %v2156_v24 }
 0x6e2   : > { %v4376_v35 = vpop.permute.xlu0 %2428 }
 0x6e4   : > { %v2252_v9 = vpop.permute.xlu1 %2251 }
 0x6e5   : > { %v2254_v4 = vrot.slane %v2252_v9, 4 }
 0x6e6   : > { %v2098_v32 = vpop.permute.xlu0 %2097 }
 0x6e7   : > { %v2101_v48 = vrot.slane %v2098_v32, 4 }
 0x6e8   : > { %v2306_v17 = vpop.permute.xlu1 %2305 }
 0x6e9   : > { %v2103_v57 = vsel %vm548_vm8, %v2101_v48, %v2102_v52  ;;  %v2308_v63 = vrot.slane %v2306_v17, 4 }
 0x6ea   : > { %v2250_v45 = vpop.permute.xlu0 %2249  ;;  %v2104_v44 = vsel %vm587_vm6, %v2098_v32, %v2103_v57 }
 0x6eb   : > { %v2253_v51 = vrot.slane %v2250_v45, 4 }
 0x6ec   : > { %v2073_v27 = vpop.permute.xlu1 %2072 }
 0x6ed   : > { %v2075_v0 = vrot.slane %v2073_v27, 4  ;;  %v2255_v62 = vsel %vm548_vm8, %v2253_v51, %v2254_v4  ;;  %v2359_v51 = vsel %vm635_vm3, %v2353_v26, %v2358_v36  ;;  %v2406_v4 = vrot.slane %v4366_v55, 4 }
 0x6ee   : > { %v2304_v12 = vpop.permute.xlu0 %2303  ;;  %v2256_v42 = vsel %vm587_vm6, %v2250_v45, %v2255_v62  ;;  %v2158_v45 = vsel %vm661_vm4, %v2152_v29, %v2157_v39  ;;  %v3506_v26 = vcombine.high %v4282_v3, %v2359_v51  ;;  %v2633_v62 = vrot.slane %v4372_v15, 4 }
 0x6ef   : > { %v2307_v54 = vrot.slane %v2304_v12, 4  ;;  %v3666_v39 = vpack.c.bf16 %v4272_v6, %v4272_v6 }
 0x6f0   : > { %v2279_v41 = vpop.permute.xlu1 %2278 }
 0x6f1   : > { %v2309_v61 = vsel %vm548_vm8, %v2307_v54, %v2308_v63  ;;  %v2281_v34 = vrot.slane %v2279_v41, 4  ;;  %v2432_v63 = vrot.slane %v4376_v35, 4 }
 0x6f2   : > { %v4378_v43 = vpop.permute.xlu0 %2401  ;;  %v2310_v53 = vsel %vm624_vm5, %v2304_v12, %v2309_v61 }
 0x6f3   : > { %v3498_v48 = vcombine.high %v2310_v53, %v4287_v13 }
 0x6f4   : > { %v2127_v46 = vpop.permute.xlu1 %2126 }
 0x6f5   : > { %v2129_v17 = vrot.slane %v2127_v46, 4 }
 0x6f6   : > { %v4380_v20 = vpop.permute.xlu0 %2678 }
 0x6f8   : > { %v4382_v49 = vpop.permute.xlu1 %2528 }
 0x6fa   : > { %v2071_v56 = vpop.permute.xlu0 %2070 }
 0x6fb   : > { %v2074_v1 = vrot.slane %v2071_v56, 4 }
 0x6fc   : > { %v2203_v11 = vpop.permute.xlu1 %2202 }
 0x6fd   : > { %v2076_v7 = vsel %vm548_vm8, %v2074_v1, %v2075_v0  ;;  %v3497_v0 = vcombine.low %v2310_v53, %v4287_v13  ;;  %v2205_v10 = vrot.slane %v2203_v11, 4 }
 0x6fe   : > { %v2077_v31 = vsel %vm550_vm7, %v2071_v56, %v2076_v7  ;;  %v2277_v23 = vpop.permute.xlu0 %2276  ;;  %v2405_v56 = vrot.slane %v4378_v43, 4  ;;  %v3505_v7 = vcombine.low %v4282_v3, %v2359_v51 }
 0x6ff   : > { %v3487_v33 = vcombine.low %v2077_v31, %v2104_v44  ;;  %v3488_v47 = vcombine.high %v2077_v31, %v2104_v44  ;;  %v2280_v50 = vrot.slane %v2277_v23, 4  ;;  %v2433_v44 = vrot.slane %v4374_v22, 4 }
 0x700   : > { %v4396_v9 = vpop.permute.xlu1 %2555  ;;  %v2407_v25 = vsel %vm548_vm8, %v2405_v56, %v2406_v4 }
 0x701   : > { %v2282_v38 = vsel %vm548_vm8, %v2280_v50, %v2281_v34  ;;  %3021 = vmatprep.subr.bf16.mxu0 %v3488_v47  ;;  %v2408_v61 = vsel %vm635_vm3, %v4378_v43, %v2407_v25  ;;  %v2434_v11 = vsel %vm548_vm8, %v2432_v63, %v2433_v44  ;;  %v2634_v50 = vrot.slane %v4368_v58, 4 }
 0x702   : > { %v2283_v30 = vsel %vm587_vm6, %v2277_v23, %v2282_v38  ;;  %v2125_v32 = vpop.permute.xlu0 %2124  ;;  %3022 = vmatpush1.bf16.msra.mxu0 %v3487_v33  ;;  %v3667_v43 = vpack.c.bf16 %v4274_v59, %v4274_v59  ;;  %v3521_v24 = vcombine.low %v2408_v61, %v2408_v61  ;;  %v3522_v36 = vcombine.high %v2408_v61, %v2408_v61 }
 0x703   : > { %v3489_v27 = vcombine.low %v2256_v42, %v2283_v30  ;;  %v3490_v37 = vcombine.high %v2256_v42, %v2283_v30  ;;  %v2128_v41 = vrot.slane %v2125_v32, 4  ;;  %v2635_v42 = vsel %vm548_vm8, %v2633_v62, %v2634_v50 }
 0x704   : > { %v4407_v1 = vpop.permute.xlu1 %2707  ;;  %v2435_v53 = vsel %vm661_vm4, %v4376_v35, %v2434_v11  ;;  %v2682_v58 = vrot.slane %v4380_v20, 4 }
 0x705   : > { %v2130_v52 = vsel %vm548_vm8, %v2128_v41, %v2129_v17  ;;  %3062 = vmatprep.subr.bf16.mxu1 %v3490_v37  ;;  %v2636_v17 = vsel %vm635_vm3, %v4372_v15, %v2635_v42  ;;  %v3492_v35 = vcombine.high %v2435_v53, %v4287_v13  ;;  %v3004_v37 = vsel %vm548_vm8, %v3521_v24, 0 }
 0x706   : > { %v2131_v12 = vsel %vm587_vm6, %v2125_v32, %v2130_v52  ;;  %v4403_v54 = vpop.permute.xlu0 %2526  ;;  %3063 = vmatpush1.bf16.msra.mxu1 %v3489_v27  ;;  %v2683_v32 = vrot.slane %v4370_v18, 4  ;;  %v2998_v27 = vsel %vm548_vm8, %v3666_v39, 0  ;;  %v4449_v52 = vld [vmem:[%s4515_s10] sm:$0x1]  ;;  %v3502_v15 = vcombine.high %v2636_v17, %v4284_v8 }
 0x707   : > { %v3495_v46 = vcombine.low %v2131_v12, %v2158_v45  ;;  %v3496_v57 = vcombine.high %v2131_v12, %v2158_v45  ;;  %3064 = vmatprep.subr.bf16.mxu1 %v3498_v48  ;;  %v3491_v45 = vcombine.low %v2435_v53, %v4287_v13  ;;  %v2558_v12 = vrot.slane %v4396_v9, 4 }
 0x708   : > { %v2480_v31 = vpop.permute.xlu1 %2479  ;;  %v2684_v18 = vsel %vm548_vm8, %v2682_v58, %v2683_v32  ;;  %v2530_v56 = vrot.slane %v4403_v54, 4  ;;  %v2710_v9 = vrot.slane %v4407_v1, 4  ;;  %v3501_v25 = vcombine.low %v2636_v17, %v4284_v8 }
 0x709   : > { %3023 = vmatprep.subr.bf16.mxu0 %v3496_v57  ;;  %v2482_v38 = vrot.slane %v2480_v31, 4  ;;  %v3707_v42 = vmov 1966171168  }
 0x70a   : > { %v2201_v29 = vpop.permute.xlu0 %2200  ;;  %3024 = vmatpush1.bf16.msra.mxu0 %v3495_v46  ;;  %3065 = vmatpush1.bf16.msra.mxu1 %v3497_v0  ;;  %v2531_v0 = vrot.slane %v4382_v49, 4  ;;  %v3198_v53 = vunpack.c.l.s4 %v3707_v42 }
 0x70b   : > { %v2204_v60 = vrot.slane %v2201_v29, 4  ;;  %3025 = vmatprep.subr.bf16.mxu0 %v4293_v16  ;;  %3066 = vmatprep.subr.bf16.mxu1 %v3506_v26 }
 0x70c   : > { %v2735_v6 = vpop.permute.xlu1 %2734  ;;  %v3199_v58 = vunpack.c.0.s8 %v3198_v53 }
 0x70d   : > { %v2206_v55 = vsel %vm548_vm8, %v2204_v60, %v2205_v10  ;;  %v2737_v26 = vrot.slane %v2735_v6, 4 }
 0x70e   : > { %v2207_v23 = vsel %vm661_vm4, %v2201_v29, %v2206_v55  ;;  %v2478_v34 = vpop.permute.xlu0 %2477  ;;  %3026 = vmatpush1.bf16.msra.mxu0 %v4298_v28  ;;  %3067 = vmatpush1.bf16.msra.mxu1 %v3505_v7 }
 0x70f   : > { %v3511_v33 = vcombine.low %v2207_v23, %v4284_v8  ;;  %v3512_v22 = vcombine.high %v2207_v23, %v4284_v8  ;;  %v2481_v47 = vrot.slane %v2478_v34, 4  ;;  %3068 = vmatprep.subr.bf16.mxu1 %v4301_v19 }
 0x710   : > { %v2583_v4 = vpop.permute.xlu1 %2582 }
 0x711   : > { %3027 = vmatprep.subr.bf16.mxu0 %v3512_v22  ;;  %v2483_v59 = vsel %vm548_vm8, %v2481_v47, %v2482_v38 }
 0x712   : > { %v2554_v30 = vpop.permute.xlu0 %2553  ;;  %3028 = vmatpush1.bf16.msra.mxu0 %v3511_v33  ;;  %3069 = vmatpush1.bf16.msra.mxu1 %v4304_v21  ;;  %v2484_v41 = vsel %vm661_vm4, %v2478_v34, %v2483_v59 }
 0x713   : > { %3527 = vmatprep.subr.msk.bf16.mxu0 %vm548_vm8, %v3667_v43  ;;  %3529 = vmatprep.subr.msk.bf16.mxu1 %vm548_vm8, %v3522_v36  ;;  %v2557_v51 = vrot.slane %v2554_v30, 4  ;;  %v3500_v46 = vcombine.high %v4282_v3, %v2484_v41  ;;  %v3499_v10 = vcombine.low %v4282_v3, %v2484_v41  ;;  %v2585_v3 = vrot.slane %v2583_v4, 4 }
 0x714   : > { %v2762_v62 = vpop.permute.xlu1 %2761 }
 0x715   : > { %v2559_v29 = vsel %vm548_vm8, %v2557_v51, %v2558_v12 }
 0x716   : > { %v2706_v48 = vpop.permute.xlu0 %2705  ;;  %3030 = vmatpush1.bf16.msra.mxu0 %v2998_v27  ;;  %3071 = vmatpush1.bf16.msra.mxu1 %v3004_v37  ;;  %v2560_v60 = vsel %vm561_vm1, %v2554_v30, %v2559_v29 }
 0x717   : > { %3103 = vmatprep.subr.bf16.mxu0 %v3492_v35  ;;  %3144 = vmatprep.subr.bf16.mxu1 %v4293_v16  ;;  %v2709_v57 = vrot.slane %v2706_v48, 4  ;;  %v2685_v16 = vsel %vm635_vm3, %v4380_v20, %v2684_v18 }
 0x718   : > { %v3510_v20 = vcombine.high %v4291_v14, %v2685_v16 }
 0x719   : > { %3528 = vmatmul.mubr.msk.bf16.vlgmr.msra.gmra.mrb[8].mxu0 %vm883_vm9, %v4449_v52  ;;  %3530 = vmatmul.mubr.msk.bf16.vlgmr.msra.gmra.mrb[12].mxu1 %vm883_vm9, %v4449_v52  ;;  %v2711_v49 = vsel %vm548_vm8, %v2709_v57, %v2710_v9 }
 0x71a   : > { %v2733_v13 = vpop.permute.xlu0 %2732  ;;  %3104 = vmatpush1.bf16.msra.mxu0 %v3491_v45  ;;  %3145 = vmatpush1.bf16.msra.mxu1 %v4298_v28  ;;  %v2532_v28 = vsel %vm548_vm8, %v2530_v56, %v2531_v0  ;;  %v2712_v61 = vsel %vm561_vm1, %v2706_v48, %v2711_v49  ;;  %v3202_v48 = vsub.s32 %v3199_v58, %v3784_v2 }
 0x71b   : > { %v2736_v63 = vrot.slane %v2733_v13, 4  ;;  %3105 = vmatprep.subr.bf16.mxu0 %v3500_v46  ;;  %3146 = vmatprep.subr.bf16.mxu1 %v3502_v15  ;;  %v2533_v55 = vsel %vm598_vm2, %v4403_v54, %v2532_v28 }
 0x71c   : > { %3135 = vmatprep.mubr.bf16.mxu0 %v3706_v40  ;;  %3176 = vmatprep.mubr.bf16.mxu1 %v3706_v40  ;;  %v3509_v40 = vcombine.low %v4291_v14, %v2685_v16  ;;  %v3516_v31 = vcombine.high %v2533_v55, %v2560_v60  ;;  %v3515_v14 = vcombine.low %v2533_v55, %v2560_v60 }
 0x71d   : > { %v2738_v1 = vsel %vm548_vm8, %v2736_v63, %v2737_v26 }
 0x71e   : > { %v2739_v7 = vsel %vm561_vm1, %v2733_v13, %v2738_v1  ;;  %v2581_v44 = vpop.permute.xlu0 %2580  ;;  %3106 = vmatpush1.bf16.msra.mxu0 %v3499_v10  ;;  %3147 = vmatpush1.bf16.msra.mxu1 %v3501_v25 }
 0x71f   : > { %v2584_v8 = vrot.slane %v2581_v44, 4  ;;  %3107 = vmatprep.subr.bf16.mxu0 %v4301_v19  ;;  %3148 = vmatprep.subr.bf16.mxu1 %v3510_v20  ;;  %v3518_v23 = vcombine.high %v2712_v61, %v2739_v7  ;;  %v2764_v19 = vrot.slane %v2762_v62, 4  ;;  %v3517_v47 = vcombine.low %v2712_v61, %v2739_v7 }
 0x721   : > { %v2586_v34 = vsel %vm548_vm8, %v2584_v8, %v2585_v3 }
 0x722   : > { %v2587_v11 = vsel %vm561_vm1, %v2581_v44, %v2586_v34  ;;  %v2760_v33 = vpop.permute.xlu0 %2759  ;;  %3108 = vmatpush1.bf16.msra.mxu0 %v4304_v21  ;;  %3149 = vmatpush1.bf16.msra.mxu1 %v3509_v40 }
 0x723   : > { %v2763_v22 = vrot.slane %v2760_v33, 4  ;;  %3109 = vmatprep.subr.bf16.mxu0 %v3516_v31  ;;  %3150 = vmatprep.subr.bf16.mxu1 %v3518_v23  ;;  %v3523_v54 = vcombine.low %v2587_v11, %v2587_v11  ;;  %v3524_v50 = vcombine.high %v2587_v11, %v2587_v11 }
 0x725   : > { %v2765_v43 = vsel %vm548_vm8, %v2763_v22, %v2764_v19  ;;  %v3010_v21 = vsel %vm548_vm8, %v3523_v54, 0 }
 0x726   : > { %v2766_v24 = vsel %vm523_vm0, %v2760_v33, %v2765_v43  ;;  %3110 = vmatpush1.bf16.msra.mxu0 %v3515_v14  ;;  %3151 = vmatpush1.bf16.msra.mxu1 %v3517_v47 }
 0x727   : > { %v3525_v36 = vcombine.low %v2766_v24, %v2766_v24  ;;  %v3526_v38 = vcombine.high %v2766_v24, %v2766_v24  ;;  %3531 = vmatprep.subr.msk.bf16.mxu0 %vm548_vm8, %v3524_v50 }
 0x729   : > { %3533 = vmatprep.subr.msk.bf16.mxu1 %vm548_vm8, %v3526_v38  ;;  %v3016_v39 = vsel %vm548_vm8, %v3525_v36, 0 }
 0x72a   : > { %3112 = vmatpush1.bf16.msra.mxu0 %v3010_v21  ;;  %3153 = vmatpush1.bf16.msra.mxu1 %v3016_v39 }
 0x72d   : > { %3532 = vmatmul.mubr.msk.bf16.vlgmr.msra.gmra.mrb[12].mxu0 %vm883_vm9, %v4449_v52  ;;  %3534 = vmatmul.mubr.msk.bf16.vlgmr.msra.gmra.mrb[16].mxu1 %vm883_vm9, %v4449_v52 }
 0x733   : > { %v2808_v30 = vpop.permute.xlu0 %2807 }
 0x734   : > { %v2813_v59 = vrot.slane %v2808_v30, %v3793_v5 }
 0x7ec   : > { %v3055_v32 = vpop.f32.mrb[8].mxu0  ;;  %v3096_v6 = vpop.f32.mrb[12].mxu1 }
 0x7ed   : > { %v3056_v17 = vadd.f32 %v3055_v32, %v2813_v59  ;;  %v3097_v35 = vadd.f32 %v3096_v6, %v2813_v59  ;;  %v3057_v27 = vpop.f32.mrb[9].mxu0  ;;  %v3098_v37 = vpop.f32.mrb[13].mxu1 }
 0x7ee   : > { %v3058_v41 = vadd.f32 %v3057_v27, %v2813_v59  ;;  %v3099_v18 = vadd.f32 %v3098_v37, %v2813_v59  ;;  %v3059_v51 = vpop.f32.mrb[10].mxu0  ;;  %v3100_v15 = vpop.f32.mrb[14].mxu1 }
 0x7ef   : > { %v3060_v45 = vpop.f32.mrb[11].mxu0  ;;  %v3101_v52 = vpop.f32.mrb[15].mxu1 }
 0x7f0   : > { %v3193_v12 = vcombine.low %v3056_v17, %v3058_v41  ;;  %v3194_v56 = vcombine.low %v3097_v35, %v3099_v18 }
 0x7f2   : > { %v3203_v46 = vrot.slane %v3193_v12, %v3202_v48  ;;  %v3210_v57 = vrot.slane %v3194_v56, %v3202_v48 }
 0x7f4   : > { %v3225_v16 = vcombine.low %v3203_v46, %v3210_v57 }
 0x7f6   : > { %v3233_v44 = vrot.slane %v3225_v16, %v3202_v48 }
 0x800   : > { %v3137_v5 = vpop.f32.mrb[12].mxu0  ;;  %v3178_v0 = vpop.f32.mrb[16].mxu1 }
 0x801   : > { %v3138_v4 = vadd.f32 %v3137_v5, %v2813_v59  ;;  %v3179_v13 = vadd.f32 %v3178_v0, %v2813_v59  ;;  %v3139_v9 = vpop.f32.mrb[13].mxu0  ;;  %v3180_v26 = vpop.f32.mrb[17].mxu1 }
 0x802   : > { %v3140_v29 = vadd.f32 %v3139_v9, %v2813_v59  ;;  %v3181_v63 = vadd.f32 %v3180_v26, %v2813_v59  ;;  %v3141_v2 = vpop.f32.mrb[14].mxu0  ;;  %v3182_v25 = vpop.f32.mrb[18].mxu1 }
 0x803   : > { %v3142_v10 = vpop.f32.mrb[15].mxu0  ;;  %v3183_v20 = vpop.f32.mrb[19].mxu1 }
 0x804   : > { %v3195_v28 = vcombine.low %v3138_v4, %v3140_v29  ;;  %v3196_v49 = vcombine.low %v3179_v13, %v3181_v63 }
 0x806   : > { %v3217_v1 = vrot.slane %v3195_v28, %v3202_v48  ;;  %v3224_v60 = vrot.slane %v3196_v49, %v3202_v48 }
 0x808   : > { %v3226_v7 = vcombine.low %v3217_v1, %v3224_v60 }
 0x80a   : > { %v3240_v3 = vrot.slane %v3226_v7, %v3202_v48 }
 0x80c   : > { %v3241_v8 = vcombine.low %v3233_v44, %v3240_v3 }
 0x80e   : > { %3243 = vst [vmem:[%s413_s26] sm:$0xff] %v3241_v8 }
 0x80f PF: > { %s24_s23 = sadd.s32 1, %s3696_s23  }
 0x810   : > { %p21_p4 = scmp.ge.s32.totalorder %s24_s23, 4  }
 0x812   :  { %23 = sbr.rel (!%p21_p4) target bundleno = 3 (0x3), region = 105 }

</bundles_post_ra>
